<compile_context>
chip_gen: v5e
topology: v5e:2x2
jax: 0.10.0
libtpu: 0.0.40
codegen_flags: <defaults>
</compile_context>

<pallas_src>
import math

import jax
import jax.numpy as jnp
import numpy as np
from jax.experimental import pallas as pl
from jax.experimental.pallas import tpu as pltpu

# ---------------- config (small, consistent with the module) ----------------
D_MODEL = 32          # config.hidden_size
N_HEADS = 4           # config.num_attention_heads
HEAD_DIM = D_MODEL // N_HEADS
D_FF = 64             # config.intermediate_size
MAX_ROLE = 4          # config.max_role_embeddings
N_LAYERS = 2          # config.encoder_num_hidden_layers
BATCH = 2
SEQ = 8               # task_count + 2
TASK_COUNT = SEQ - 2

# ROLE_LEFT / ROLE_RIGHT are module-level constants in the original repo.
ROLE_LEFT = 1
ROLE_RIGHT = 2

EPS = 1e-5
INV_SQRT2 = 0.7071067811865476

# Row-max subtraction in softmax. Scores here are tiny (0.02-scale weights) and
# masked entries are exactly -inf (exp -> 0), so this could be disabled to save
# one XLU reduce + one VPU subtract per layer; keep ON unless input scale is
# controlled by the caller.
SOFTMAX_SUBTRACT_MAX = True

# Packed-slab column offsets (additive slab): [qkv_add | bo | b1 | b2]
_OFF_QKV = 0
_OFF_BO = 3 * D_MODEL
_OFF_B1 = 4 * D_MODEL
_OFF_B2 = 4 * D_MODEL + D_FF
_ADD_W = 4 * D_MODEL + D_FF + D_MODEL   # 224
# Packed weight slab A columns: [Wq | Wk | Wv | Wo | W1]
_WA_W = 3 * D_MODEL + D_MODEL + D_FF     # 192


# ------------------------------ Pallas kernel -------------------------------
def binary_encoder_kernel(x_ref, mask_ref, wa_ref, wb_ref, add_ref, out_ref):
    """Fused forward of the whole BinaryEncoder on a (B*S, D) slab.

    x_ref    : (BS, D)            flattened batch of token rows
    mask_ref : (H*BS, BS)         head-tiled block-diagonal additive mask (0 / -inf)
    wa_ref   : (L, D, 192)        per-layer [Wq|Wk|Wv|Wo|W1]
    wb_ref   : (L, F, D)          per-layer W2
    add_ref  : (L, BS, 224)       per-layer additive slab:
                                  [pos@Wq+bq | pos@Wk+bk | bv | bo | b1 | b2]
    """
    f32 = jnp.float32
    x = x_ref[...]                 # (BS, D)
    mask = mask_ref[...]           # (H*BS, BS)
    BS = x.shape[0]
    scale = 1.0 / math.sqrt(HEAD_DIM)
    n_layers = wa_ref.shape[0]

    for l in range(n_layers):                       # static unroll: fused layers
        wqkv = wa_ref[l, :, 0:3 * D_MODEL]          # (D, 3D)
        wo = wa_ref[l, :, 3 * D_MODEL:4 * D_MODEL]  # (D, D)
        w1 = wa_ref[l, :, 4 * D_MODEL:_WA_W]        # (D, F)
        w2 = wb_ref[l]                              # (F, D)
        add = add_ref[l]                            # (BS, 224)

        # ---- fused QKV projection: one (16,32)@(32,96) push + one add ----
        # (x + pos) @ Wq + bq == x @ Wq + (pos @ Wq + bq); the parenthesised
        # term (and bv) was constant-folded into `add` at pack time.
        qkv = jnp.dot(x, wqkv, preferred_element_type=f32) + add[:, _OFF_QKV:_OFF_BO]
        q = qkv[:, 0:D_MODEL] * scale               # fold 1/sqrt(dh) into q
        k = qkv[:, D_MODEL:2 * D_MODEL]
        v = qkv[:, 2 * D_MODEL:3 * D_MODEL]

        # ---- per-head scores, stacked along sublanes -> ONE softmax ----
        score_parts = []
        for h in range(N_HEADS):                    # static unroll over heads
            lo, hi = h * HEAD_DIM, (h + 1) * HEAD_DIM
            # contract feature dims of both operands -> no k.T materialized
            score_parts.append(jax.lax.dot_general(
                q[:, lo:hi], k[:, lo:hi], (((1,), (1,)), ((), ())),
                preferred_element_type=f32))        # (BS, BS)
        scores = jnp.concatenate(score_parts, axis=0) + mask      # (H*BS, BS)
        if SOFTMAX_SUBTRACT_MAX:
            scores = scores - jnp.max(scores, axis=-1, keepdims=True)
        p = jnp.exp(scores)
        p = p * pl.reciprocal(jnp.sum(p, axis=-1, keepdims=True), approx=True)

        # ---- per-head attention output, lane-concat -> ONE Wo matmul ----
        out_parts = []
        for h in range(N_HEADS):
            lo, hi = h * HEAD_DIM, (h + 1) * HEAD_DIM
            out_parts.append(jnp.dot(p[h * BS:(h + 1) * BS, :], v[:, lo:hi],
                                     preferred_element_type=f32))  # (BS, Dh)
        attn = jnp.concatenate(out_parts, axis=1)                   # (BS, D)
        src2 = jnp.dot(attn, wo, preferred_element_type=f32) + add[:, _OFF_BO:_OFF_B1]

        # ---- residual + InstanceNorm1d-as-used (per-row norm over D) ----
        y = x + src2
        mu = jnp.mean(y, axis=-1, keepdims=True)
        var = jnp.mean((y - mu) * (y - mu), axis=-1, keepdims=True)
        y = (y - mu) * jax.lax.rsqrt(var + EPS)

        # ---- FFN: linear1 -> exact (erf) GELU -> linear2 ----
        h1 = jnp.dot(y, w1, preferred_element_type=f32) + add[:, _OFF_B1:_OFF_B2]
        h1 = 0.5 * h1 * (1.0 + jax.lax.erf(h1 * INV_SQRT2))
        h2 = jnp.dot(h1, w2, preferred_element_type=f32) + add[:, _OFF_B2:_ADD_W]

        # ---- residual + second InstanceNorm ----
        z = y + h2
        mu2 = jnp.mean(z, axis=-1, keepdims=True)
        var2 = jnp.mean((z - mu2) * (z - mu2), axis=-1, keepdims=True)
        x = (z - mu2) * jax.lax.rsqrt(var2 + EPS)

    out_ref[...] = x


# ----------------------------- host-side packing -----------------------------
def build_pos_ids_and_mask(task_count):
    """Exactly the cached pos_ids / src_mask construction of BinaryEncoder."""
    pos_ids = np.array([0] * task_count + [ROLE_LEFT, ROLE_RIGHT], dtype=np.int32)
    S = task_count + 2
    mask = np.full((S, S), -np.inf, dtype=np.float32)
    for i in range(S):
        if i < task_count:
            mask[i, i] = 0.0
        mask[i, -1] = 0.0
        mask[i, -2] = 0.0
    return pos_ids, mask


def build_attn_mask(batch, seq, n_heads):
    """Block-diagonal (flattened-batch) mask, tiled once per head along sublanes
    so the kernel adds it to the stacked (H*BS, BS) score slab with one add."""
    _, mask = build_pos_ids_and_mask(seq - 2)
    S = seq
    big = np.full((batch * S, batch * S), -np.inf, dtype=np.float32)
    for b in range(batch):
        big[b * S:(b + 1) * S, b * S:(b + 1) * S] = mask
    return jnp.asarray(np.tile(big, (n_heads, 1)))          # (H*BS, BS)


def make_params(key):
    """Deterministic synthetic weights, one independent set per layer.
    Weights are stored (in, out) so the kernel computes x @ W + b
    (equivalent to PyTorch Linear's x @ W^T + b)."""
    s = 0.02

    def layer_params(k):
        ks = jax.random.split(k, 12)
        n = lambda kk, shp: (s * jax.random.normal(kk, shp)).astype(jnp.float32)
        return {
            "wq": n(ks[0], (D_MODEL, D_MODEL)), "bq": n(ks[1], (1, D_MODEL)),
            "wk": n(ks[2], (D_MODEL, D_MODEL)), "bk": n(ks[3], (1, D_MODEL)),
            "wv": n(ks[4], (D_MODEL, D_MODEL)), "bv": n(ks[5], (1, D_MODEL)),
            "wo": n(ks[6], (D_MODEL, D_MODEL)), "bo": n(ks[7], (1, D_MODEL)),
            "w1": n(ks[8], (D_MODEL, D_FF)),    "b1": n(ks[9], (1, D_FF)),
            "w2": n(ks[10], (D_FF, D_MODEL)),   "b2": n(ks[11], (1, D_MODEL)),
        }

    layers = [layer_params(jax.random.fold_in(key, l)) for l in range(N_LAYERS)]
    pos_table = (s * jax.random.normal(jax.random.fold_in(key, 99),
                                       (MAX_ROLE, D_MODEL))).astype(jnp.float32)
    return layers, pos_table


def pack_params(layers, pos_table, batch, seq):
    """Pack per-layer weights into 3 slabs and constant-fold pos@Wq/Wk + biases."""
    pos_ids, _ = build_pos_ids_and_mask(seq - 2)
    pos_emb = pos_table[jnp.asarray(pos_ids)]                # (S, D)
    pos_bsd = jnp.tile(pos_emb, (batch, 1))                  # (BS, D)
    BS = batch * seq

    wa_list, wb_list, add_list = [], [], []
    for p in layers:
        wa_list.append(jnp.concatenate(
            [p["wq"], p["wk"], p["wv"], p["wo"], p["w1"]], axis=1))   # (D, 192)
        wb_list.append(p["w2"])                                       # (F, D)
        q_add = pos_bsd @ p["wq"] + p["bq"]                           # (BS, D)
        k_add = pos_bsd @ p["wk"] + p["bk"]                           # (BS, D)
        v_add = jnp.broadcast_to(p["bv"], (BS, D_MODEL))
        bo = jnp.broadcast_to(p["bo"], (BS, D_MODEL))
        b1 = jnp.broadcast_to(p["b1"], (BS, D_FF))
        b2 = jnp.broadcast_to(p["b2"], (BS, D_MODEL))
        add_list.append(jnp.concatenate(
            [q_add, k_add, v_add, bo, b1, b2], axis=1))               # (BS, 224)
    return jnp.stack(wa_list), jnp.stack(wb_list), jnp.stack(add_list)


# ----------------------------- BinaryEncoder glue ----------------------------
@jax.jit
def binary_encoder_forward(src, mask_hbs, wa, wb, add_slab):
    """Whole BinaryEncoder forward in a single fused pallas_call (no grid).
    All host-side mask/pos/weight packing is done once outside this function."""
    B, S, D = src.shape
    x2d = src.reshape(B * S, D)
    vmem = lambda: pl.BlockSpec(memory_space=pltpu.MemorySpace.VMEM)
    out2d = pl.pallas_call(
        binary_encoder_kernel,
        out_shape=jax.ShapeDtypeStruct((B * S, D), jnp.float32),
        in_specs=[vmem() for _ in range(5)],
        out_specs=vmem(),
    )(x2d, mask_hbs, wa, wb, add_slab)
    return out2d.reshape(B, S, D)


# ------------------------------ reference (JAX) ------------------------------
def _ref_layer(x, pos_emb, mask, p):
    qk = x + pos_emb
    q = qk @ p["wq"] + p["bq"]
    k = qk @ p["wk"] + p["bk"]
    v = x @ p["wv"] + p["bv"]
    B, S, D = x.shape

    def heads(t):
        return t.reshape(B, S, N_HEADS, HEAD_DIM).transpose(0, 2, 1, 3)

    qh, kh, vh = heads(q) / math.sqrt(HEAD_DIM), heads(k), heads(v)
    sc = jnp.einsum("bhqd,bhkd->bhqk", qh, kh) + mask
    pattn = jax.nn.softmax(sc, axis=-1)
    a = jnp.einsum("bhqk,bhkd->bhqd", pattn, vh).transpose(0, 2, 1, 3).reshape(B, S, D)
    src2 = a @ p["wo"] + p["bo"]
    y = x + src2
    y = (y - y.mean(-1, keepdims=True)) * jax.lax.rsqrt(y.var(-1, keepdims=True) + EPS)
    h = y @ p["w1"] + p["b1"]
    h = 0.5 * h * (1.0 + jax.lax.erf(h * INV_SQRT2))
    z = y + h @ p["w2"] + p["b2"]
    return (z - z.mean(-1, keepdims=True)) * jax.lax.rsqrt(z.var(-1, keepdims=True) + EPS)


def _ref_forward(src, layers, pos_table):
    pos_ids, mask = build_pos_ids_and_mask(src.shape[1] - 2)
    pos_emb = pos_table[jnp.asarray(pos_ids)]
    m = jnp.asarray(mask)
    out = src
    for p in layers:
        out = _ref_layer(out, pos_emb, m, p)
    return out


# ----------------------------------- main ------------------------------------
if __name__ == "__main__":
    key = jax.random.PRNGKey(0)
    k_src, k_par = jax.random.split(key)
    src = jax.random.normal(k_src, (BATCH, SEQ, D_MODEL), dtype=jnp.float32)

    layers, pos_table = make_params(k_par)
    # Build all constant inputs ONCE (outside the jitted forward).
    wa, wb, add_slab = pack_params(layers, pos_table, BATCH, SEQ)
    mask_hbs = build_attn_mask(BATCH, SEQ, N_HEADS)

    out = jax.block_until_ready(
        binary_encoder_forward(src, mask_hbs, wa, wb, add_slab))
    ref = jax.block_until_ready(_ref_forward(src, layers, pos_table))

    # pl.reciprocal(approx=True) in the softmax denominator has ~1e-4 relative
    # error; compare against the exact-softmax reference at a relaxed tolerance.
    np.testing.assert_allclose(np.asarray(out), np.asarray(ref), rtol=2e-3, atol=2e-3)

    print("KERNEL_OK")
</pallas_src>

<mosaic_0001>
module attributes {stable_mosaic.version = 11 : i64} {
  func.func @binary_encoder_kernel(%arg0: memref<16x32xf32, #tpu.memory_space<vmem>>, %arg1: memref<64x16xf32, #tpu.memory_space<vmem>>, %arg2: memref<2x32x192xf32, #tpu.memory_space<vmem>>, %arg3: memref<2x64x32xf32, #tpu.memory_space<vmem>>, %arg4: memref<2x16x224xf32, #tpu.memory_space<vmem>>, %arg5: memref<16x32xf32, #tpu.memory_space<vmem>>) attributes {dimension_semantics = [], scalar_prefetch = 0 : i64, scratch_operands = 0 : i64, tpu.core_type = #tpu.core_type<tc>} {
    %c0 = arith.constant 0 : index
    %c0_0 = arith.constant 0 : index
    %0 = vector.load %arg0[%c0, %c0_0] : memref<16x32xf32, #tpu.memory_space<vmem>>, vector<16x32xf32>
    %c0_1 = arith.constant 0 : index
    %c0_2 = arith.constant 0 : index
    %1 = vector.load %arg1[%c0_1, %c0_2] : memref<64x16xf32, #tpu.memory_space<vmem>>, vector<64x16xf32>
    %c0_3 = arith.constant 0 : index
    %c0_4 = arith.constant 0 : index
    %c0_5 = arith.constant 0 : index
    %2 = vector.load %arg2[%c0_3, %c0_4, %c0_5] : memref<2x32x192xf32, #tpu.memory_space<vmem>>, vector<1x32x96xf32>
    %3 = vector.shape_cast %2 : vector<1x32x96xf32> to vector<32x96xf32>
    %c0_6 = arith.constant 0 : index
    %c0_7 = arith.constant 0 : index
    %c96 = arith.constant 96 : index
    %4 = vector.load %arg2[%c0_6, %c0_7, %c96] : memref<2x32x192xf32, #tpu.memory_space<vmem>>, vector<1x32x32xf32>
    %5 = vector.shape_cast %4 : vector<1x32x32xf32> to vector<32x32xf32>
    %c0_8 = arith.constant 0 : index
    %c0_9 = arith.constant 0 : index
    %c128 = arith.constant 128 : index
    %6 = vector.load %arg2[%c0_8, %c0_9, %c128] : memref<2x32x192xf32, #tpu.memory_space<vmem>>, vector<1x32x64xf32>
    %7 = vector.shape_cast %6 : vector<1x32x64xf32> to vector<32x64xf32>
    %c0_10 = arith.constant 0 : index
    %c0_11 = arith.constant 0 : index
    %c0_12 = arith.constant 0 : index
    %8 = vector.load %arg3[%c0_10, %c0_11, %c0_12] : memref<2x64x32xf32, #tpu.memory_space<vmem>>, vector<1x64x32xf32>
    %9 = vector.shape_cast %8 : vector<1x64x32xf32> to vector<64x32xf32>
    %c0_13 = arith.constant 0 : index
    %c0_14 = arith.constant 0 : index
    %c0_15 = arith.constant 0 : index
    %10 = vector.load %arg4[%c0_13, %c0_14, %c0_15] : memref<2x16x224xf32, #tpu.memory_space<vmem>>, vector<1x16x224xf32>
    %11 = vector.shape_cast %10 : vector<1x16x224xf32> to vector<16x224xf32>
    %cst = arith.constant dense<0.000000e+00> : vector<16x96xf32>
    %12 = tpu.matmul %0, %3, %cst {dimension_numbers = #tpu.dot_dimension_numbers<[1], [0], [0], [1], [0, 0, 1, 1], [], []>} : vector<16x32xf32>, vector<32x96xf32>, vector<16x96xf32> -> vector<16x96xf32>
    %13 = vector.extract_strided_slice %11 {offsets = [0, 0], sizes = [16, 96], strides = [1, 1]} : vector<16x224xf32> to vector<16x96xf32>
    %14 = arith.addf %12, %13 : vector<16x96xf32>
    %15 = vector.extract_strided_slice %14 {offsets = [0, 0], sizes = [16, 32], strides = [1, 1]} : vector<16x96xf32> to vector<16x32xf32>
    %cst_16 = arith.constant 0.353553385 : f32
    %16 = vector.broadcast %cst_16 : f32 to vector<16x32xf32>
    %17 = arith.mulf %15, %16 : vector<16x32xf32>
    %18 = vector.extract_strided_slice %14 {offsets = [0, 32], sizes = [16, 32], strides = [1, 1]} : vector<16x96xf32> to vector<16x32xf32>
    %19 = vector.extract_strided_slice %14 {offsets = [0, 64], sizes = [16, 32], strides = [1, 1]} : vector<16x96xf32> to vector<16x32xf32>
    %20 = vector.extract_strided_slice %17 {offsets = [0, 0], sizes = [16, 8], strides = [1, 1]} : vector<16x32xf32> to vector<16x8xf32>
    %21 = vector.extract_strided_slice %18 {offsets = [0, 0], sizes = [16, 8], strides = [1, 1]} : vector<16x32xf32> to vector<16x8xf32>
    %cst_17 = arith.constant dense<0.000000e+00> : vector<16x16xf32>
    %22 = tpu.matmul %20, %21, %cst_17 {dimension_numbers = #tpu.dot_dimension_numbers<[1], [1], [0], [0], [0, 0, 1, 0], [], []>} : vector<16x8xf32>, vector<16x8xf32>, vector<16x16xf32> -> vector<16x16xf32>
    %23 = vector.extract_strided_slice %17 {offsets = [0, 8], sizes = [16, 8], strides = [1, 1]} : vector<16x32xf32> to vector<16x8xf32>
    %24 = vector.extract_strided_slice %18 {offsets = [0, 8], sizes = [16, 8], strides = [1, 1]} : vector<16x32xf32> to vector<16x8xf32>
    %cst_18 = arith.constant dense<0.000000e+00> : vector<16x16xf32>
    %25 = tpu.matmul %23, %24, %cst_18 {dimension_numbers = #tpu.dot_dimension_numbers<[1], [1], [0], [0], [0, 0, 1, 0], [], []>} : vector<16x8xf32>, vector<16x8xf32>, vector<16x16xf32> -> vector<16x16xf32>
    %26 = vector.extract_strided_slice %17 {offsets = [0, 16], sizes = [16, 8], strides = [1, 1]} : vector<16x32xf32> to vector<16x8xf32>
    %27 = vector.extract_strided_slice %18 {offsets = [0, 16], sizes = [16, 8], strides = [1, 1]} : vector<16x32xf32> to vector<16x8xf32>
    %cst_19 = arith.constant dense<0.000000e+00> : vector<16x16xf32>
    %28 = tpu.matmul %26, %27, %cst_19 {dimension_numbers = #tpu.dot_dimension_numbers<[1], [1], [0], [0], [0, 0, 1, 0], [], []>} : vector<16x8xf32>, vector<16x8xf32>, vector<16x16xf32> -> vector<16x16xf32>
    %29 = vector.extract_strided_slice %17 {offsets = [0, 24], sizes = [16, 8], strides = [1, 1]} : vector<16x32xf32> to vector<16x8xf32>
    %30 = vector.extract_strided_slice %18 {offsets = [0, 24], sizes = [16, 8], strides = [1, 1]} : vector<16x32xf32> to vector<16x8xf32>
    %cst_20 = arith.constant dense<0.000000e+00> : vector<16x16xf32>
    %31 = tpu.matmul %29, %30, %cst_20 {dimension_numbers = #tpu.dot_dimension_numbers<[1], [1], [0], [0], [0, 0, 1, 0], [], []>} : vector<16x8xf32>, vector<16x8xf32>, vector<16x16xf32> -> vector<16x16xf32>
    %32 = tpu.concatenate %22, %25, %28, %31 in 0 : vector<16x16xf32>, vector<16x16xf32>, vector<16x16xf32>, vector<16x16xf32> -> vector<64x16xf32>
    %33 = arith.addf %32, %1 : vector<64x16xf32>
    %cst_21 = arith.constant dense<0xFF800000> : vector<64xf32>
    %34 = vector.multi_reduction <maximumf>, %33, %cst_21 [1] : vector<64x16xf32> to vector<64xf32>
    %35 = vector.shape_cast %34 : vector<64xf32> to vector<64x1xf32>
    %36 = vector.broadcast %35 : vector<64x1xf32> to vector<64x16xf32>
    %37 = arith.subf %33, %36 : vector<64x16xf32>
    %38 = math.exp %37 : vector<64x16xf32>
    %cst_22 = arith.constant dense<0.000000e+00> : vector<64xf32>
    %39 = vector.multi_reduction <add>, %38, %cst_22 [1] : vector<64x16xf32> to vector<64xf32>
    %40 = vector.shape_cast %39 : vector<64xf32> to vector<64x1xf32>
    %41 = tpu.reciprocal %40 {approx = true} : vector<64x1xf32> -> vector<64x1xf32>
    %42 = vector.broadcast %41 : vector<64x1xf32> to vector<64x16xf32>
    %43 = arith.mulf %38, %42 : vector<64x16xf32>
    %44 = vector.extract_strided_slice %43 {offsets = [0, 0], sizes = [16, 16], strides = [1, 1]} : vector<64x16xf32> to vector<16x16xf32>
    %45 = vector.extract_strided_slice %19 {offsets = [0, 0], sizes = [16, 8], strides = [1, 1]} : vector<16x32xf32> to vector<16x8xf32>
    %cst_23 = arith.constant dense<0.000000e+00> : vector<16x8xf32>
    %46 = tpu.matmul %44, %45, %cst_23 {dimension_numbers = #tpu.dot_dimension_numbers<[1], [0], [0], [1], [0, 0, 1, 1], [], []>} : vector<16x16xf32>, vector<16x8xf32>, vector<16x8xf32> -> vector<16x8xf32>
    %47 = vector.extract_strided_slice %43 {offsets = [16, 0], sizes = [16, 16], strides = [1, 1]} : vector<64x16xf32> to vector<16x16xf32>
    %48 = vector.extract_strided_slice %19 {offsets = [0, 8], sizes = [16, 8], strides = [1, 1]} : vector<16x32xf32> to vector<16x8xf32>
    %cst_24 = arith.constant dense<0.000000e+00> : vector<16x8xf32>
    %49 = tpu.matmul %47, %48, %cst_24 {dimension_numbers = #tpu.dot_dimension_numbers<[1], [0], [0], [1], [0, 0, 1, 1], [], []>} : vector<16x16xf32>, vector<16x8xf32>, vector<16x8xf32> -> vector<16x8xf32>
    %50 = vector.extract_strided_slice %43 {offsets = [32, 0], sizes = [16, 16], strides = [1, 1]} : vector<64x16xf32> to vector<16x16xf32>
    %51 = vector.extract_strided_slice %19 {offsets = [0, 16], sizes = [16, 8], strides = [1, 1]} : vector<16x32xf32> to vector<16x8xf32>
    %cst_25 = arith.constant dense<0.000000e+00> : vector<16x8xf32>
    %52 = tpu.matmul %50, %51, %cst_25 {dimension_numbers = #tpu.dot_dimension_numbers<[1], [0], [0], [1], [0, 0, 1, 1], [], []>} : vector<16x16xf32>, vector<16x8xf32>, vector<16x8xf32> -> vector<16x8xf32>
    %53 = vector.extract_strided_slice %43 {offsets = [48, 0], sizes = [16, 16], strides = [1, 1]} : vector<64x16xf32> to vector<16x16xf32>
    %54 = vector.extract_strided_slice %19 {offsets = [0, 24], sizes = [16, 8], strides = [1, 1]} : vector<16x32xf32> to vector<16x8xf32>
    %cst_26 = arith.constant dense<0.000000e+00> : vector<16x8xf32>
    %55 = tpu.matmul %53, %54, %cst_26 {dimension_numbers = #tpu.dot_dimension_numbers<[1], [0], [0], [1], [0, 0, 1, 1], [], []>} : vector<16x16xf32>, vector<16x8xf32>, vector<16x8xf32> -> vector<16x8xf32>
    %56 = tpu.concatenate %46, %49, %52, %55 in 1 : vector<16x8xf32>, vector<16x8xf32>, vector<16x8xf32>, vector<16x8xf32> -> vector<16x32xf32>
    %cst_27 = arith.constant dense<0.000000e+00> : vector<16x32xf32>
    %57 = tpu.matmul %56, %5, %cst_27 {dimension_numbers = #tpu.dot_dimension_numbers<[1], [0], [0], [1], [0, 0, 1, 1], [], []>} : vector<16x32xf32>, vector<32x32xf32>, vector<16x32xf32> -> vector<16x32xf32>
    %58 = vector.extract_strided_slice %11 {offsets = [0, 96], sizes = [16, 32], strides = [1, 1]} : vector<16x224xf32> to vector<16x32xf32>
    %59 = arith.addf %57, %58 : vector<16x32xf32>
    %60 = arith.addf %0, %59 : vector<16x32xf32>
    %cst_28 = arith.constant dense<0.000000e+00> : vector<16xf32>
    %61 = vector.multi_reduction <add>, %60, %cst_28 [1] : vector<16x32xf32> to vector<16xf32>
    %62 = vector.shape_cast %61 : vector<16xf32> to vector<16x1xf32>
    %cst_29 = arith.constant 3.200000e+01 : f32
    %63 = vector.broadcast %cst_29 : f32 to vector<16x1xf32>
    %64 = arith.divf %62, %63 : vector<16x1xf32>
    %65 = vector.broadcast %64 : vector<16x1xf32> to vector<16x32xf32>
    %66 = arith.subf %60, %65 : vector<16x32xf32>
    %67 = vector.broadcast %64 : vector<16x1xf32> to vector<16x32xf32>
    %68 = arith.subf %60, %67 : vector<16x32xf32>
    %69 = arith.mulf %66, %68 : vector<16x32xf32>
    %cst_30 = arith.constant dense<0.000000e+00> : vector<16xf32>
    %70 = vector.multi_reduction <add>, %69, %cst_30 [1] : vector<16x32xf32> to vector<16xf32>
    %71 = vector.shape_cast %70 : vector<16xf32> to vector<16x1xf32>
    %cst_31 = arith.constant 3.200000e+01 : f32
    %72 = vector.broadcast %cst_31 : f32 to vector<16x1xf32>
    %73 = arith.divf %71, %72 : vector<16x1xf32>
    %74 = vector.broadcast %64 : vector<16x1xf32> to vector<16x32xf32>
    %75 = arith.subf %60, %74 : vector<16x32xf32>
    %cst_32 = arith.constant 9.99999974E-6 : f32
    %76 = vector.broadcast %cst_32 : f32 to vector<16x1xf32>
    %77 = arith.addf %73, %76 : vector<16x1xf32>
    %78 = math.rsqrt %77 : vector<16x1xf32>
    %79 = vector.broadcast %78 : vector<16x1xf32> to vector<16x32xf32>
    %80 = arith.mulf %75, %79 : vector<16x32xf32>
    %cst_33 = arith.constant dense<0.000000e+00> : vector<16x64xf32>
    %81 = tpu.matmul %80, %7, %cst_33 {dimension_numbers = #tpu.dot_dimension_numbers<[1], [0], [0], [1], [0, 0, 1, 1], [], []>} : vector<16x32xf32>, vector<32x64xf32>, vector<16x64xf32> -> vector<16x64xf32>
    %82 = vector.extract_strided_slice %11 {offsets = [0, 128], sizes = [16, 64], strides = [1, 1]} : vector<16x224xf32> to vector<16x64xf32>
    %83 = arith.addf %81, %82 : vector<16x64xf32>
    %cst_34 = arith.constant 5.000000e-01 : f32
    %84 = vector.broadcast %cst_34 : f32 to vector<16x64xf32>
    %85 = arith.mulf %84, %83 : vector<16x64xf32>
    %cst_35 = arith.constant 0.707106769 : f32
    %86 = vector.broadcast %cst_35 : f32 to vector<16x64xf32>
    %87 = arith.mulf %83, %86 : vector<16x64xf32>
    %88 = math.erf %87 : vector<16x64xf32>
    %cst_36 = arith.constant 1.000000e+00 : f32
    %89 = vector.broadcast %cst_36 : f32 to vector<16x64xf32>
    %90 = arith.addf %89, %88 : vector<16x64xf32>
    %91 = arith.mulf %85, %90 : vector<16x64xf32>
    %cst_37 = arith.constant dense<0.000000e+00> : vector<16x32xf32>
    %92 = tpu.matmul %91, %9, %cst_37 {dimension_numbers = #tpu.dot_dimension_numbers<[1], [0], [0], [1], [0, 0, 1, 1], [], []>} : vector<16x64xf32>, vector<64x32xf32>, vector<16x32xf32> -> vector<16x32xf32>
    %93 = vector.extract_strided_slice %11 {offsets = [0, 192], sizes = [16, 32], strides = [1, 1]} : vector<16x224xf32> to vector<16x32xf32>
    %94 = arith.addf %92, %93 : vector<16x32xf32>
    %95 = arith.addf %80, %94 : vector<16x32xf32>
    %cst_38 = arith.constant dense<0.000000e+00> : vector<16xf32>
    %96 = vector.multi_reduction <add>, %95, %cst_38 [1] : vector<16x32xf32> to vector<16xf32>
    %97 = vector.shape_cast %96 : vector<16xf32> to vector<16x1xf32>
    %cst_39 = arith.constant 3.200000e+01 : f32
    %98 = vector.broadcast %cst_39 : f32 to vector<16x1xf32>
    %99 = arith.divf %97, %98 : vector<16x1xf32>
    %100 = vector.broadcast %99 : vector<16x1xf32> to vector<16x32xf32>
    %101 = arith.subf %95, %100 : vector<16x32xf32>
    %102 = vector.broadcast %99 : vector<16x1xf32> to vector<16x32xf32>
    %103 = arith.subf %95, %102 : vector<16x32xf32>
    %104 = arith.mulf %101, %103 : vector<16x32xf32>
    %cst_40 = arith.constant dense<0.000000e+00> : vector<16xf32>
    %105 = vector.multi_reduction <add>, %104, %cst_40 [1] : vector<16x32xf32> to vector<16xf32>
    %106 = vector.shape_cast %105 : vector<16xf32> to vector<16x1xf32>
    %cst_41 = arith.constant 3.200000e+01 : f32
    %107 = vector.broadcast %cst_41 : f32 to vector<16x1xf32>
    %108 = arith.divf %106, %107 : vector<16x1xf32>
    %109 = vector.broadcast %99 : vector<16x1xf32> to vector<16x32xf32>
    %110 = arith.subf %95, %109 : vector<16x32xf32>
    %cst_42 = arith.constant 9.99999974E-6 : f32
    %111 = vector.broadcast %cst_42 : f32 to vector<16x1xf32>
    %112 = arith.addf %108, %111 : vector<16x1xf32>
    %113 = math.rsqrt %112 : vector<16x1xf32>
    %114 = vector.broadcast %113 : vector<16x1xf32> to vector<16x32xf32>
    %115 = arith.mulf %110, %114 : vector<16x32xf32>
    %c1 = arith.constant 1 : index
    %c0_43 = arith.constant 0 : index
    %c0_44 = arith.constant 0 : index
    %116 = vector.load %arg2[%c1, %c0_43, %c0_44] : memref<2x32x192xf32, #tpu.memory_space<vmem>>, vector<1x32x96xf32>
    %117 = vector.shape_cast %116 : vector<1x32x96xf32> to vector<32x96xf32>
    %c1_45 = arith.constant 1 : index
    %c0_46 = arith.constant 0 : index
    %c96_47 = arith.constant 96 : index
    %118 = vector.load %arg2[%c1_45, %c0_46, %c96_47] : memref<2x32x192xf32, #tpu.memory_space<vmem>>, vector<1x32x32xf32>
    %119 = vector.shape_cast %118 : vector<1x32x32xf32> to vector<32x32xf32>
    %c1_48 = arith.constant 1 : index
    %c0_49 = arith.constant 0 : index
    %c128_50 = arith.constant 128 : index
    %120 = vector.load %arg2[%c1_48, %c0_49, %c128_50] : memref<2x32x192xf32, #tpu.memory_space<vmem>>, vector<1x32x64xf32>
    %121 = vector.shape_cast %120 : vector<1x32x64xf32> to vector<32x64xf32>
    %c1_51 = arith.constant 1 : index
    %c0_52 = arith.constant 0 : index
    %c0_53 = arith.constant 0 : index
    %122 = vector.load %arg3[%c1_51, %c0_52, %c0_53] : memref<2x64x32xf32, #tpu.memory_space<vmem>>, vector<1x64x32xf32>
    %123 = vector.shape_cast %122 : vector<1x64x32xf32> to vector<64x32xf32>
    %c1_54 = arith.constant 1 : index
    %c0_55 = arith.constant 0 : index
    %c0_56 = arith.constant 0 : index
    %124 = vector.load %arg4[%c1_54, %c0_55, %c0_56] : memref<2x16x224xf32, #tpu.memory_space<vmem>>, vector<1x16x224xf32>
    %125 = vector.shape_cast %124 : vector<1x16x224xf32> to vector<16x224xf32>
    %cst_57 = arith.constant dense<0.000000e+00> : vector<16x96xf32>
    %126 = tpu.matmul %115, %117, %cst_57 {dimension_numbers = #tpu.dot_dimension_numbers<[1], [0], [0], [1], [0, 0, 1, 1], [], []>} : vector<16x32xf32>, vector<32x96xf32>, vector<16x96xf32> -> vector<16x96xf32>
    %127 = vector.extract_strided_slice %125 {offsets = [0, 0], sizes = [16, 96], strides = [1, 1]} : vector<16x224xf32> to vector<16x96xf32>
    %128 = arith.addf %126, %127 : vector<16x96xf32>
    %129 = vector.extract_strided_slice %128 {offsets = [0, 0], sizes = [16, 32], strides = [1, 1]} : vector<16x96xf32> to vector<16x32xf32>
    %cst_58 = arith.constant 0.353553385 : f32
    %130 = vector.broadcast %cst_58 : f32 to vector<16x32xf32>
    %131 = arith.mulf %129, %130 : vector<16x32xf32>
    %132 = vector.extract_strided_slice %128 {offsets = [0, 32], sizes = [16, 32], strides = [1, 1]} : vector<16x96xf32> to vector<16x32xf32>
    %133 = vector.extract_strided_slice %128 {offsets = [0, 64], sizes = [16, 32], strides = [1, 1]} : vector<16x96xf32> to vector<16x32xf32>
    %134 = vector.extract_strided_slice %131 {offsets = [0, 0], sizes = [16, 8], strides = [1, 1]} : vector<16x32xf32> to vector<16x8xf32>
    %135 = vector.extract_strided_slice %132 {offsets = [0, 0], sizes = [16, 8], strides = [1, 1]} : vector<16x32xf32> to vector<16x8xf32>
    %cst_59 = arith.constant dense<0.000000e+00> : vector<16x16xf32>
    %136 = tpu.matmul %134, %135, %cst_59 {dimension_numbers = #tpu.dot_dimension_numbers<[1], [1], [0], [0], [0, 0, 1, 0], [], []>} : vector<16x8xf32>, vector<16x8xf32>, vector<16x16xf32> -> vector<16x16xf32>
    %137 = vector.extract_strided_slice %131 {offsets = [0, 8], sizes = [16, 8], strides = [1, 1]} : vector<16x32xf32> to vector<16x8xf32>
    %138 = vector.extract_strided_slice %132 {offsets = [0, 8], sizes = [16, 8], strides = [1, 1]} : vector<16x32xf32> to vector<16x8xf32>
    %cst_60 = arith.constant dense<0.000000e+00> : vector<16x16xf32>
    %139 = tpu.matmul %137, %138, %cst_60 {dimension_numbers = #tpu.dot_dimension_numbers<[1], [1], [0], [0], [0, 0, 1, 0], [], []>} : vector<16x8xf32>, vector<16x8xf32>, vector<16x16xf32> -> vector<16x16xf32>
    %140 = vector.extract_strided_slice %131 {offsets = [0, 16], sizes = [16, 8], strides = [1, 1]} : vector<16x32xf32> to vector<16x8xf32>
    %141 = vector.extract_strided_slice %132 {offsets = [0, 16], sizes = [16, 8], strides = [1, 1]} : vector<16x32xf32> to vector<16x8xf32>
    %cst_61 = arith.constant dense<0.000000e+00> : vector<16x16xf32>
    %142 = tpu.matmul %140, %141, %cst_61 {dimension_numbers = #tpu.dot_dimension_numbers<[1], [1], [0], [0], [0, 0, 1, 0], [], []>} : vector<16x8xf32>, vector<16x8xf32>, vector<16x16xf32> -> vector<16x16xf32>
    %143 = vector.extract_strided_slice %131 {offsets = [0, 24], sizes = [16, 8], strides = [1, 1]} : vector<16x32xf32> to vector<16x8xf32>
    %144 = vector.extract_strided_slice %132 {offsets = [0, 24], sizes = [16, 8], strides = [1, 1]} : vector<16x32xf32> to vector<16x8xf32>
    %cst_62 = arith.constant dense<0.000000e+00> : vector<16x16xf32>
    %145 = tpu.matmul %143, %144, %cst_62 {dimension_numbers = #tpu.dot_dimension_numbers<[1], [1], [0], [0], [0, 0, 1, 0], [], []>} : vector<16x8xf32>, vector<16x8xf32>, vector<16x16xf32> -> vector<16x16xf32>
    %146 = tpu.concatenate %136, %139, %142, %145 in 0 : vector<16x16xf32>, vector<16x16xf32>, vector<16x16xf32>, vector<16x16xf32> -> vector<64x16xf32>
    %147 = arith.addf %146, %1 : vector<64x16xf32>
    %cst_63 = arith.constant dense<0xFF800000> : vector<64xf32>
    %148 = vector.multi_reduction <maximumf>, %147, %cst_63 [1] : vector<64x16xf32> to vector<64xf32>
    %149 = vector.shape_cast %148 : vector<64xf32> to vector<64x1xf32>
    %150 = vector.broadcast %149 : vector<64x1xf32> to vector<64x16xf32>
    %151 = arith.subf %147, %150 : vector<64x16xf32>
    %152 = math.exp %151 : vector<64x16xf32>
    %cst_64 = arith.constant dense<0.000000e+00> : vector<64xf32>
    %153 = vector.multi_reduction <add>, %152, %cst_64 [1] : vector<64x16xf32> to vector<64xf32>
    %154 = vector.shape_cast %153 : vector<64xf32> to vector<64x1xf32>
    %155 = tpu.reciprocal %154 {approx = true} : vector<64x1xf32> -> vector<64x1xf32>
    %156 = vector.broadcast %155 : vector<64x1xf32> to vector<64x16xf32>
    %157 = arith.mulf %152, %156 : vector<64x16xf32>
    %158 = vector.extract_strided_slice %157 {offsets = [0, 0], sizes = [16, 16], strides = [1, 1]} : vector<64x16xf32> to vector<16x16xf32>
    %159 = vector.extract_strided_slice %133 {offsets = [0, 0], sizes = [16, 8], strides = [1, 1]} : vector<16x32xf32> to vector<16x8xf32>
    %cst_65 = arith.constant dense<0.000000e+00> : vector<16x8xf32>
    %160 = tpu.matmul %158, %159, %cst_65 {dimension_numbers = #tpu.dot_dimension_numbers<[1], [0], [0], [1], [0, 0, 1, 1], [], []>} : vector<16x16xf32>, vector<16x8xf32>, vector<16x8xf32> -> vector<16x8xf32>
    %161 = vector.extract_strided_slice %157 {offsets = [16, 0], sizes = [16, 16], strides = [1, 1]} : vector<64x16xf32> to vector<16x16xf32>
    %162 = vector.extract_strided_slice %133 {offsets = [0, 8], sizes = [16, 8], strides = [1, 1]} : vector<16x32xf32> to vector<16x8xf32>
    %cst_66 = arith.constant dense<0.000000e+00> : vector<16x8xf32>
    %163 = tpu.matmul %161, %162, %cst_66 {dimension_numbers = #tpu.dot_dimension_numbers<[1], [0], [0], [1], [0, 0, 1, 1], [], []>} : vector<16x16xf32>, vector<16x8xf32>, vector<16x8xf32> -> vector<16x8xf32>
    %164 = vector.extract_strided_slice %157 {offsets = [32, 0], sizes = [16, 16], strides = [1, 1]} : vector<64x16xf32> to vector<16x16xf32>
    %165 = vector.extract_strided_slice %133 {offsets = [0, 16], sizes = [16, 8], strides = [1, 1]} : vector<16x32xf32> to vector<16x8xf32>
    %cst_67 = arith.constant dense<0.000000e+00> : vector<16x8xf32>
    %166 = tpu.matmul %164, %165, %cst_67 {dimension_numbers = #tpu.dot_dimension_numbers<[1], [0], [0], [1], [0, 0, 1, 1], [], []>} : vector<16x16xf32>, vector<16x8xf32>, vector<16x8xf32> -> vector<16x8xf32>
    %167 = vector.extract_strided_slice %157 {offsets = [48, 0], sizes = [16, 16], strides = [1, 1]} : vector<64x16xf32> to vector<16x16xf32>
    %168 = vector.extract_strided_slice %133 {offsets = [0, 24], sizes = [16, 8], strides = [1, 1]} : vector<16x32xf32> to vector<16x8xf32>
    %cst_68 = arith.constant dense<0.000000e+00> : vector<16x8xf32>
    %169 = tpu.matmul %167, %168, %cst_68 {dimension_numbers = #tpu.dot_dimension_numbers<[1], [0], [0], [1], [0, 0, 1, 1], [], []>} : vector<16x16xf32>, vector<16x8xf32>, vector<16x8xf32> -> vector<16x8xf32>
    %170 = tpu.concatenate %160, %163, %166, %169 in 1 : vector<16x8xf32>, vector<16x8xf32>, vector<16x8xf32>, vector<16x8xf32> -> vector<16x32xf32>
    %cst_69 = arith.constant dense<0.000000e+00> : vector<16x32xf32>
    %171 = tpu.matmul %170, %119, %cst_69 {dimension_numbers = #tpu.dot_dimension_numbers<[1], [0], [0], [1], [0, 0, 1, 1], [], []>} : vector<16x32xf32>, vector<32x32xf32>, vector<16x32xf32> -> vector<16x32xf32>
    %172 = vector.extract_strided_slice %125 {offsets = [0, 96], sizes = [16, 32], strides = [1, 1]} : vector<16x224xf32> to vector<16x32xf32>
    %173 = arith.addf %171, %172 : vector<16x32xf32>
    %174 = arith.addf %115, %173 : vector<16x32xf32>
    %cst_70 = arith.constant dense<0.000000e+00> : vector<16xf32>
    %175 = vector.multi_reduction <add>, %174, %cst_70 [1] : vector<16x32xf32> to vector<16xf32>
    %176 = vector.shape_cast %175 : vector<16xf32> to vector<16x1xf32>
    %cst_71 = arith.constant 3.200000e+01 : f32
    %177 = vector.broadcast %cst_71 : f32 to vector<16x1xf32>
    %178 = arith.divf %176, %177 : vector<16x1xf32>
    %179 = vector.broadcast %178 : vector<16x1xf32> to vector<16x32xf32>
    %180 = arith.subf %174, %179 : vector<16x32xf32>
    %181 = vector.broadcast %178 : vector<16x1xf32> to vector<16x32xf32>
    %182 = arith.subf %174, %181 : vector<16x32xf32>
    %183 = arith.mulf %180, %182 : vector<16x32xf32>
    %cst_72 = arith.constant dense<0.000000e+00> : vector<16xf32>
    %184 = vector.multi_reduction <add>, %183, %cst_72 [1] : vector<16x32xf32> to vector<16xf32>
    %185 = vector.shape_cast %184 : vector<16xf32> to vector<16x1xf32>
    %cst_73 = arith.constant 3.200000e+01 : f32
    %186 = vector.broadcast %cst_73 : f32 to vector<16x1xf32>
    %187 = arith.divf %185, %186 : vector<16x1xf32>
    %188 = vector.broadcast %178 : vector<16x1xf32> to vector<16x32xf32>
    %189 = arith.subf %174, %188 : vector<16x32xf32>
    %cst_74 = arith.constant 9.99999974E-6 : f32
    %190 = vector.broadcast %cst_74 : f32 to vector<16x1xf32>
    %191 = arith.addf %187, %190 : vector<16x1xf32>
    %192 = math.rsqrt %191 : vector<16x1xf32>
    %193 = vector.broadcast %192 : vector<16x1xf32> to vector<16x32xf32>
    %194 = arith.mulf %189, %193 : vector<16x32xf32>
    %cst_75 = arith.constant dense<0.000000e+00> : vector<16x64xf32>
    %195 = tpu.matmul %194, %121, %cst_75 {dimension_numbers = #tpu.dot_dimension_numbers<[1], [0], [0], [1], [0, 0, 1, 1], [], []>} : vector<16x32xf32>, vector<32x64xf32>, vector<16x64xf32> -> vector<16x64xf32>
    %196 = vector.extract_strided_slice %125 {offsets = [0, 128], sizes = [16, 64], strides = [1, 1]} : vector<16x224xf32> to vector<16x64xf32>
    %197 = arith.addf %195, %196 : vector<16x64xf32>
    %cst_76 = arith.constant 5.000000e-01 : f32
    %198 = vector.broadcast %cst_76 : f32 to vector<16x64xf32>
    %199 = arith.mulf %198, %197 : vector<16x64xf32>
    %cst_77 = arith.constant 0.707106769 : f32
    %200 = vector.broadcast %cst_77 : f32 to vector<16x64xf32>
    %201 = arith.mulf %197, %200 : vector<16x64xf32>
    %202 = math.erf %201 : vector<16x64xf32>
    %cst_78 = arith.constant 1.000000e+00 : f32
    %203 = vector.broadcast %cst_78 : f32 to vector<16x64xf32>
    %204 = arith.addf %203, %202 : vector<16x64xf32>
    %205 = arith.mulf %199, %204 : vector<16x64xf32>
    %cst_79 = arith.constant dense<0.000000e+00> : vector<16x32xf32>
    %206 = tpu.matmul %205, %123, %cst_79 {dimension_numbers = #tpu.dot_dimension_numbers<[1], [0], [0], [1], [0, 0, 1, 1], [], []>} : vector<16x64xf32>, vector<64x32xf32>, vector<16x32xf32> -> vector<16x32xf32>
    %207 = vector.extract_strided_slice %125 {offsets = [0, 192], sizes = [16, 32], strides = [1, 1]} : vector<16x224xf32> to vector<16x32xf32>
    %208 = arith.addf %206, %207 : vector<16x32xf32>
    %209 = arith.addf %194, %208 : vector<16x32xf32>
    %cst_80 = arith.constant dense<0.000000e+00> : vector<16xf32>
    %210 = vector.multi_reduction <add>, %209, %cst_80 [1] : vector<16x32xf32> to vector<16xf32>
    %211 = vector.shape_cast %210 : vector<16xf32> to vector<16x1xf32>
    %cst_81 = arith.constant 3.200000e+01 : f32
    %212 = vector.broadcast %cst_81 : f32 to vector<16x1xf32>
    %213 = arith.divf %211, %212 : vector<16x1xf32>
    %214 = vector.broadcast %213 : vector<16x1xf32> to vector<16x32xf32>
    %215 = arith.subf %209, %214 : vector<16x32xf32>
    %216 = vector.broadcast %213 : vector<16x1xf32> to vector<16x32xf32>
    %217 = arith.subf %209, %216 : vector<16x32xf32>
    %218 = arith.mulf %215, %217 : vector<16x32xf32>
    %cst_82 = arith.constant dense<0.000000e+00> : vector<16xf32>
    %219 = vector.multi_reduction <add>, %218, %cst_82 [1] : vector<16x32xf32> to vector<16xf32>
    %220 = vector.shape_cast %219 : vector<16xf32> to vector<16x1xf32>
    %cst_83 = arith.constant 3.200000e+01 : f32
    %221 = vector.broadcast %cst_83 : f32 to vector<16x1xf32>
    %222 = arith.divf %220, %221 : vector<16x1xf32>
    %223 = vector.broadcast %213 : vector<16x1xf32> to vector<16x32xf32>
    %224 = arith.subf %209, %223 : vector<16x32xf32>
    %cst_84 = arith.constant 9.99999974E-6 : f32
    %225 = vector.broadcast %cst_84 : f32 to vector<16x1xf32>
    %226 = arith.addf %222, %225 : vector<16x1xf32>
    %227 = math.rsqrt %226 : vector<16x1xf32>
    %228 = vector.broadcast %227 : vector<16x1xf32> to vector<16x32xf32>
    %229 = arith.mulf %224, %228 : vector<16x32xf32>
    %c0_85 = arith.constant 0 : index
    %c0_86 = arith.constant 0 : index
    %230 = vector.load %arg5[%c0_85, %c0_86] : memref<16x32xf32, #tpu.memory_space<vmem>>, vector<16x32xf32>
    tpu.vector_store %arg5[%c0_85, %c0_86], %229 {strides = array<i32>} : memref<16x32xf32, #tpu.memory_space<vmem>>, vector<16x32xf32>,
    return
  }
}

</mosaic_0001>

<bundles_post_ra>
// kernel: binary_encoder_forward.1
= control target key start
LH: loop header
LB: loop body
LE: loop exit
PB: predicated region body
PF: predicated region fallthrough
CT: control target
= control target key end

     0   :  { %s2504_s0 = inlined_call_operand.vmem [shape: f32[16,32], index: 0, kind: input, shape index: {}]   ;;  %s2505_s1 = inlined_call_operand.vmem [shape: f32[64,16], index: 1, kind: input, shape index: {}]   ;;  %s2506_s2 = inlined_call_operand.vmem [shape: f32[2,32,192], index: 2, kind: input, shape index: {}]   ;;  %s2507_s3 = inlined_call_operand.vmem [shape: f32[2,64,32], index: 3, kind: input, shape index: {}]   ;;  %s2508_s4 = inlined_call_operand.vmem [shape: f32[2,16,224], index: 4, kind: input, shape index: {}]   ;;  %s2509_s5 = inlined_call_operand.hbm [shape: f32[16,32], index: 5, kind: output, shape index: {}]  }
   0x1   :  { %v1950_v0 = vld [vmem:[%s2506_s2 + $0x30] sm:$0xff]  ;;  %v1955_v1 = vld [vmem:[%s2506_s2 + $0x20] sm:$0xff] }
   0x2   :  { %70 = vmatpush.msra.mxu0 %v1950_v0  ;;  %v1736_v2 = vpack.i.bf16 %v1955_v1, %v1950_v0  ;;  %v1963_v3 = vld [vmem:[%s2506_s2 + $0x10] sm:$0xff]  ;;  %v1968_v4 = vld [vmem:[%s2506_s2] sm:$0xff] }
   0x3   :  { %v1741_v5 = vpack.i.bf16 %v1968_v4, %v1963_v3 }
   0x4   :  { %10 = vsyncpa [#allocation3], 0  ;;  %71 = vmatpush.msra.mxu0 %v1955_v1  ;;  %v1977_v6 = vld [vmem:[%s2504_s0] sm:$0xff]  ;;  %vm51_vm0 = vcmask 261120   ;;  %v1985_v7 = vld [vmem:[%s2504_s0 + $0x8] sm:$0xff]  ;;  %s1899_s7 = smov 88  }
   0x5   :  { %v1992_v8 = vld [vmem:[%s2508_s4] sm:$0xff]  ;;  %s1900_s8 = smov 120   ;;  %v2000_v12 = vld [vmem:[%s2508_s4 + $0x10] sm:$0xff]  ;;  %s1901_s10 = smov 80   ;;  %vm89_vm1 = vcmask 64512   ;;  %vm248_vm2 = vcmask 130048  }
   0x6   :  { %72 = vmatpush.msra.mxu0 %v1963_v3  ;;  %s1902_s11 = smov 112   ;;  %s1903_s12 = smov 72   ;;  %v27_v31 = vld [vmem:[%s2505_s1 + $0x20] sm:$0xff]  ;;  %v29_v35 = vld [vmem:[%s2505_s1 + $0x30] sm:$0xff]  ;;  %v30_v41 = vld [vmem:[%s2505_s1 + $0x38] sm:$0xff]  ;;  %vm505_vm3 = vcmask 195584  }
   0x7   :  { %s1904_s13 = smov 104   ;;  %s1905_s14 = smov 96   ;;  %v25_v39 = vld [vmem:[%s2505_s1 + $0x10] sm:$0xff]  ;;  %v23_v45 = vld [vmem:[%s2505_s1] sm:$0xff]  ;;  %v2058_v48 = vld [vmem:[%s2505_s1 + $0x28] sm:$0xff]  ;;  %vm739_vm15 = vcmask 523264  }
   0x8   :  { %73 = vmatpush.msra.mxu0 %v1968_v4  ;;  %v26_v54 = vld [vmem:[%s2505_s1 + $0x18] sm:$0xff]  ;;  %v24_v56 = vld [vmem:[%s2505_s1 + $0x8] sm:$0xff]  ;;  %s1906_s6 = smov 56   ;;  %s1907_s0 = smov 40  }
   0x9   :  { %1610 = vmatmul.msk.f32.vlgmr.msra.gmra.mxu0 %vm51_vm0, %v1977_v6  ;;  %s1908_s9 = smov 48   ;;  %s1909_s15 = smov 64  }
   0xa   :  { %s1910_s16 = smov 32   ;;  %s1911_s17 = smov 8  }
   0xb   :  { %s1912_s18 = smov 24   ;;  %s1913_s19 = smov 16  }
  0x11   :  { %1611 = vmatmul.msk.f32.gmra.mxu0 %vm51_vm0, %v1985_v7 }
  0x86   :  { %v75_v9 = vpop.f32.mrf.mxu0 }
  0x87   :  { %v76_v10 = vadd.f32 %v75_v9, %v1992_v8 }
  0x89   :  { %127 = vrot.lane.b32.xlu1 %v76_v10, %s1899_s7  ;;  %v81_v11 = vmul.f32 0.35355338, %v76_v10 }
  0x8b   :  { %123 = vrot.lane.b32.xlu2 %v81_v11, %s1900_s8 }
  0x8e   :  { %v78_v13 = vpop.f32.mrf.mxu0 }
  0x8f   :  { %v79_v14 = vadd.f32 %v78_v13, %v2000_v12 }
  0x91   :  { %129 = vrot.lane.b32.xlu0 %v79_v14, %s1899_s7  ;;  %166 = vrot.lane.b32.xlu1 %v76_v10, %s1901_s10  ;;  %v2005_v15 = vpack.i.bf16 %v76_v10, %v79_v14  ;;  %v82_v16 = vmul.f32 0.35355338, %v79_v14 }
  0x93   :  { %162 = vrot.lane.b32.xlu2 %v81_v11, %s1902_s11 }
  0x99   :  { %168 = vrot.lane.b32.xlu0 %v79_v14, %s1901_s10  ;;  %125 = vrot.lane.b32.xlu1 %v82_v16, %s1900_s8 }
  0x9b   :  { %164 = vrot.lane.b32.xlu2 %v82_v16, %s1902_s11 }
  0xa1   :  { %207 = vrot.lane.b32.xlu0 %v79_v14, %s1903_s12  ;;  %201 = vrot.lane.b32.xlu1 %v81_v11, %s1904_s13 }
  0xa3   :  { %203 = vrot.lane.b32.xlu2 %v82_v16, %s1904_s13 }
  0xa9   :  { %205 = vrot.lane.b32.xlu0 %v76_v10, %s1903_s12  ;;  %85 = vrot.lane.b32.xlu1 %v76_v10, %s1905_s14 }
  0xb1   :  { %87 = vrot.lane.b32.xlu0 %v79_v14, %s1905_s14 }
  0xe5   :  { %v124_v19 = vpop.permute.xlu2 %123 }
  0xed   :  { %v163_v22 = vpop.permute.xlu2 %162 }
  0xf5   :  { %v165_v25 = vpop.permute.xlu2 %164 }
  0xfb   :  { %v128_v17 = vpop.permute.xlu1 %127 }
  0xfd   :  { %v204_v29 = vpop.permute.xlu2 %203 }
 0x103   :  { %v130_v18 = vpop.permute.xlu0 %129  ;;  %v167_v20 = vpop.permute.xlu1 %166 }
 0x104   :  { %1616 = vmatpush.xpose.msk.msra.mxu2 %vm89_vm1, %v130_v18 }
 0x108   :  { %1617 = vmatpush.xpose.msk.msra.mxu2 %vm89_vm1, %v128_v17 }
 0x10b   :  { %v169_v21 = vpop.permute.xlu0 %168  ;;  %1618 = vmatmul.msk.f32.vlgmr.msra.gmra.mxu2 %vm89_vm1, %v124_v19  ;;  %v126_v23 = vpop.permute.xlu1 %125 }
 0x10c   :  { %1620 = vmatpush.xpose.msk.msra.mxu3 %vm89_vm1, %v169_v21 }
 0x110   :  { %1621 = vmatpush.xpose.msk.msra.mxu3 %vm89_vm1, %v167_v20 }
 0x113   :  { %v208_v24 = vpop.permute.xlu0 %207  ;;  %1619 = vmatmul.msk.f32.gmra.mxu2 %vm89_vm1, %v126_v23  ;;  %1622 = vmatmul.msk.f32.vlgmr.msra.gmra.mxu3 %vm89_vm1, %v163_v22  ;;  %v202_v27 = vpop.permute.xlu1 %201 }
 0x114   :  { %1624 = vmatpush.xpose.msk.msrb.mxu0 %vm89_vm1, %v208_v24 }
 0x11b   :  { %v206_v26 = vpop.permute.xlu0 %205  ;;  %1623 = vmatmul.msk.f32.gmra.mxu3 %vm89_vm1, %v165_v25  ;;  %v86_v30 = vpop.permute.xlu1 %85 }
 0x11c   :  { %1625 = vmatpush.xpose.msk.msrb.mxu0 %vm89_vm1, %v206_v26 }
 0x11f   :  { %1626 = vmatmul.msk.f32.vlgmr.msrb.gmra.mxu0 %vm89_vm1, %v202_v27 }
 0x123   :  { %v88_v28 = vpop.permute.xlu0 %87 }
 0x124   :  { %1612 = vmatpush.xpose.msk.msra.mxu1 %vm89_vm1, %v88_v28 }
 0x127   :  { %1627 = vmatmul.msk.f32.gmra.mxu0 %vm89_vm1, %v204_v29 }
 0x128   :  { %1613 = vmatpush.xpose.msk.msra.mxu1 %vm89_vm1, %v86_v30 }
 0x12b   :  { %1614 = vmatmul.msk.f32.vlgmr.msra.gmra.mxu1 %vm89_vm1, %v81_v11 }
 0x133   :  { %1615 = vmatmul.msk.f32.gmra.mxu1 %vm89_vm1, %v82_v16 }
 0x18e   :  { %v156_v40 = vpop.f32.mrf.mxu2 }
 0x18f   :  { %v242_v42 = vadd.f32 %v156_v40, %v25_v39 }
 0x191   :  { %v255_v46 = vsel %vm248_vm2, %v242_v42, -inf }
 0x196   :  { %v195_v32 = vpop.f32.mrf.mxu3  ;;  %v159_v55 = vpop.f32.mrf.mxu2 }
 0x197   :  { %v244_v33 = vadd.f32 %v195_v32, %v27_v31  ;;  %v243_v57 = vadd.f32 %v159_v55, %v26_v54 }
 0x199   :  { %v261_v34 = vsel %vm248_vm2, %v244_v33, -inf  ;;  %v258_v61 = vsel %vm248_vm2, %v243_v57, -inf }
 0x19a   :  { %262 = vmax.xlane.f32.xlu0 %v261_v34 }
 0x19c   :  { %v234_v36 = vpop.f32.mrf.mxu0 }
 0x19d   :  { %v246_v37 = vadd.f32 %v234_v36, %v29_v35 }
 0x19e   :  { %v198_v49 = vpop.f32.mrf.mxu3 }
 0x19f   :  { %v267_v38 = vsel %vm248_vm2, %v246_v37, -inf  ;;  %v245_v52 = vadd.f32 %v198_v49, %v2058_v48 }
 0x1a0   :  { %268 = vmax.xlane.f32.xlu2 %v267_v38 }
 0x1a1   :  { %v264_v58 = vsel %vm248_vm2, %v245_v52, -inf }
 0x1a4   :  { %v237_v43 = vpop.f32.mrf.mxu0 }
 0x1a5   :  { %v2047_v44 = vadd.f32 %v237_v43, %v30_v41 }
 0x1a7   :  { %v270_v47 = vsel %vm248_vm2, %v2047_v44, -inf }
 0x1a8   :  { %v117_v50 = vpop.f32.mrf.mxu1  ;;  %256 = vmax.xlane.f32.xlu2 %v255_v46  ;;  %271 = vmax.xlane.f32.xlu0 %v270_v47 }
 0x1a9   :  { %v240_v51 = vadd.f32 %v117_v50, %v23_v45 }
 0x1ab   :  { %v249_v53 = vsel %vm248_vm2, %v240_v51, -inf }
 0x1ac   :  { %250 = vmax.xlane.f32.xlu1 %v249_v53 }
 0x1b0   :  { %v120_v59 = vpop.f32.mrf.mxu1  ;;  %265 = vmax.xlane.f32.xlu2 %v264_v58 }
 0x1b1   :  { %v2069_v60 = vadd.f32 %v120_v59, %v24_v56 }
 0x1b3   :  { %v252_v62 = vsel %vm248_vm2, %v2069_v60, -inf }
 0x1b4   :  { %259 = vmax.xlane.f32.xlu1 %v258_v61  ;;  %253 = vmax.xlane.f32.xlu0 %v252_v62 }
 0x20d   :  { %v263_v63 = vpop.xlane.xlu0 %262 }
 0x20e   :  { %v277_v11 = vsub.f32 %v244_v33, %v263_v63 }
 0x210   :  { %v289_v14 = vmul.f32 1.442695, %v277_v11 }
 0x213   :  { %v269_v9 = vpop.xlane.xlu2 %268 }
 0x214   :  { %v279_v10 = vsub.f32 %v246_v37, %v269_v9 }
 0x216   :  { %v293_v13 = vmul.f32 1.442695, %v279_v10 }
 0x218   :  { %1776 = vpow2.f32 %v293_v13 }
 0x219   :  { %1778 = vpow2.f32 %v289_v14 }
 0x21b   :  { %v257_v16 = vpop.xlane.xlu2 %256  ;;  %v272_v31 = vpop.xlane.xlu0 %271 }
 0x21c   :  { %v275_v17 = vsub.f32 %v242_v42, %v257_v16  ;;  %v280_v33 = vsub.f32 %v2047_v44, %v272_v31 }
 0x21e   :  { %v2074_v18 = vpop.eup %1776  ;;  %v285_v19 = vmul.f32 1.442695, %v275_v17  ;;  %v295_v35 = vmul.f32 1.442695, %v280_v33 }
 0x21f   :  { %v251_v20 = vpop.xlane.xlu1 %250  ;;  %v315_v21 = vsel %vm248_vm2, %v2074_v18, 0.0  ;;  %v2078_v22 = vpop.eup %1778 }
 0x220   :  { %316 = vadd.xlane.f32.xlu1 %v315_v21  ;;  %1780 = vpow2.f32 %v285_v19  ;;  %v309_v25 = vsel %vm248_vm2, %v2078_v22, 0.0  ;;  %v273_v37 = vsub.f32 %v240_v51, %v251_v20 }
 0x222   :  { %v281_v38 = vmul.f32 1.442695, %v273_v37 }
 0x223   :  { %v266_v32 = vpop.xlane.xlu2 %265 }
 0x224   :  { %v278_v34 = vsub.f32 %v245_v52, %v266_v32 }
 0x226   :  { %v1781_v23 = vpop.eup %1780  ;;  %v291_v36 = vmul.f32 1.442695, %v278_v34 }
 0x227   :  { %v260_v24 = vpop.xlane.xlu1 %259  ;;  %v303_v27 = vsel %vm248_vm2, %v1781_v23, 0.0  ;;  %v254_v45 = vpop.xlane.xlu0 %253 }
 0x228   :  { %v276_v26 = vsub.f32 %v243_v57, %v260_v24  ;;  %310 = vadd.xlane.f32.xlu1 %v309_v25  ;;  %304 = vadd.xlane.f32.xlu2 %v303_v27  ;;  %v274_v46 = vsub.f32 %v2069_v60, %v254_v45 }
 0x22a   :  { %v287_v28 = vmul.f32 1.442695, %v276_v26  ;;  %v283_v49 = vmul.f32 1.442695, %v274_v46 }
 0x22c   :  { %1782 = vpow2.f32 %v287_v28 }
 0x22d   :  { %1784 = vpow2.f32 %v295_v35 }
 0x22e   :  { %1786 = vpow2.f32 %v291_v36 }
 0x22f   :  { %1788 = vpow2.f32 %v281_v38 }
 0x232   :  { %v1783_v29 = vpop.eup %1782 }
 0x233   :  { %v306_v30 = vsel %vm248_vm2, %v1783_v29, 0.0  ;;  %v2091_v39 = vpop.eup %1784 }
 0x234   :  { %307 = vadd.xlane.f32.xlu0 %v306_v30  ;;  %v2093_v40 = vpop.eup %1786  ;;  %v318_v41 = vsel %vm248_vm2, %v2091_v39, 0.0 }
 0x235   :  { %v312_v42 = vsel %vm248_vm2, %v2093_v40, 0.0  ;;  %v2099_v43 = vpop.eup %1788 }
 0x236   :  { %v297_v44 = vsel %vm248_vm2, %v2099_v43, 0.0 }
 0x240   :  { %1717 = vrot.lane.b32.xlu2 %v2005_v15, %s1906_s6 }
 0x241   :  { %1727 = vrot.lane.b32.xlu1 %v2005_v15, %s1907_s0 }
 0x248   :  { %1722 = vrot.lane.b32.xlu0 %v2005_v15, %s1908_s9 }
 0x269   :  { %319 = vadd.xlane.f32.xlu2 %v318_v41 }
 0x26b   :  { %313 = vadd.xlane.f32.xlu1 %v312_v42 }
 0x272   :  { %298 = vadd.xlane.f32.xlu0 %v297_v44 }
 0x281   :  { %1737 = vrot.lane.b32.xlu2 %v1736_v2, %s1910_s16 }
 0x284   :  { %1732 = vrot.lane.b32.xlu1 %v2005_v15, %s1909_s15 }
 0x289   :  { %1742 = vrot.lane.b32.xlu2 %v1741_v5, %s1910_s16 }
 0x293   :  { %v317_v50 = vpop.xlane.xlu1 %316 }
 0x29b   :  { %v305_v47 = vpop.xlane.xlu2 %304  ;;  %v311_v57 = vpop.xlane.xlu1 %310 }
 0x29c   :  { %1790 = vrcp.f32 %v305_v47 }
 0x29d   :  { %1792 = vpow2.f32 %v283_v49 }
 0x2a2   :  { %v1791_v52 = vpop.eup %1790 }
 0x2a3   :  { %v1718_v51 = vpop.permute.xlu2 %1717  ;;  %v331_v55 = vmul.f32 %v1791_v52, %v1781_v23  ;;  %v1793_v56 = vpop.eup %1792 }
 0x2a4   :  { %v1719_v53 = vunpack.i.l.bf16 %v1718_v51  ;;  %v1720_v15 = vunpack.i.h.bf16 %v1718_v51  ;;  %v300_v0 = vsel %vm248_vm2, %v1793_v56, 0.0 }
 0x2a6   :  { %398 = vmatpush.msrb.mxu2 %v1719_v53 }
 0x2a7   :  { %v308_v54 = vpop.xlane.xlu0 %307 }
 0x2a8   :  { %1794 = vrcp.f32 %v308_v54  ;;  %399 = vmatpush.msrb.mxu2 %v1720_v15 }
 0x2a9   :  { %1630 = vmatmul.msk.f32.vlgmr.msrb.gmra.mxu2 %vm248_vm2, %v331_v55  ;;  %1796 = vrcp.f32 %v317_v50 }
 0x2aa   :  { %1798 = vrcp.f32 %v311_v57 }
 0x2ae   :  { %v1795_v1 = vpop.eup %1794  ;;  %301 = vadd.xlane.f32.xlu1 %v300_v0 }
 0x2af   :  { %v332_v2 = vmul.f32 %v1795_v1, %v1783_v29  ;;  %v1797_v59 = vpop.eup %1796 }
 0x2b0   :  { %v335_v62 = vmul.f32 %v1797_v59, %v2074_v18  ;;  %v1799_v4 = vpop.eup %1798 }
 0x2b1   :  { %1631 = vmatmul.msk.f32.gmra.mxu2 %vm248_vm2, %v332_v2  ;;  %v333_v9 = vmul.f32 %v1799_v4, %v2078_v22 }
 0x2b3   :  { %v1728_v58 = vpop.permute.xlu1 %1727 }
 0x2b4   :  { %v1729_v60 = vunpack.i.l.bf16 %v1728_v58  ;;  %v1730_v61 = vunpack.i.h.bf16 %v1728_v58  ;;  %v1914_v58 = vmov 32.0  }
 0x2b6   :  { %468 = vmatpush.msra.mxu0 %v1729_v60 }
 0x2b8   :  { %469 = vmatpush.msra.mxu0 %v1730_v61 }
 0x2b9   :  { %1634 = vmatmul.msk.f32.vlgmr.msra.gmra.mxu0 %vm248_vm2, %v335_v62 }
 0x2ba   :  { %v1723_v3 = vpop.permute.xlu0 %1722 }
 0x2bb   :  { %v1724_v5 = vunpack.i.l.bf16 %v1723_v3  ;;  %v1725_v63 = vunpack.i.h.bf16 %v1723_v3 }
 0x2bd   :  { %433 = vmatpush.msrb.mxu3 %v1724_v5 }
 0x2bf   :  { %434 = vmatpush.msrb.mxu3 %v1725_v63 }
 0x2c0   :  { %1632 = vmatmul.msk.f32.vlgmr.msrb.gmra.mxu3 %vm248_vm2, %v333_v9 }
 0x2dc   :  { %v320_v10 = vpop.xlane.xlu2 %319 }
 0x2dd   :  { %1800 = vrcp.f32 %v320_v10 }
 0x2de   :  { %v314_v11 = vpop.xlane.xlu1 %313 }
 0x2df   :  { %1802 = vrcp.f32 %v314_v11 }
 0x2e3   :  { %v1801_v13 = vpop.eup %1800 }
 0x2e4   :  { %v336_v16 = vmul.f32 %v1801_v13, %v2091_v39  ;;  %v1738_v31 = vpop.permute.xlu2 %1737 }
 0x2e5   :  { %v1803_v14 = vpop.eup %1802  ;;  %v299_v18 = vpop.xlane.xlu0 %298  ;;  %v1740_v32 = vunpack.i.h.bf16 %v1738_v31  ;;  %v1739_v33 = vunpack.i.l.bf16 %v1738_v31 }
 0x2e6   :  { %v334_v17 = vmul.f32 %v1803_v14, %v2093_v40  ;;  %1635 = vmatmul.msk.f32.gmra.mxu0 %vm248_vm2, %v336_v16  ;;  %1804 = vrcp.f32 %v299_v18  ;;  %v37_v18 = vld [vmem:[%s2506_s2 + $0x28] sm:$0xff] }
 0x2e8   :  { %1633 = vmatmul.msk.f32.gmra.mxu3 %vm248_vm2, %v334_v17  ;;  %v38_v17 = vld [vmem:[%s2506_s2 + $0x38] sm:$0xff] }
 0x2e9   :  { %632 = vmatpush.msra.mxu2 %v38_v17 }
 0x2eb   :  { %633 = vmatpush.msra.mxu2 %v37_v18 }
 0x2ec   :  { %v1805_v20 = vpop.eup %1804  ;;  %v1743_v34 = vpop.permute.xlu2 %1742 }
 0x2ed   :  { %v329_v23 = vmul.f32 %v1805_v20, %v2099_v43  ;;  %v1745_v35 = vunpack.i.h.bf16 %v1743_v34  ;;  %v1744_v36 = vunpack.i.l.bf16 %v1743_v34  ;;  %v35_v20 = vld [vmem:[%s2506_s2 + $0x8] sm:$0xff] }
 0x2f6   :  { %v1733_v19 = vpop.permute.xlu1 %1732 }
 0x2f7   :  { %v1734_v21 = vunpack.i.l.bf16 %v1733_v19  ;;  %v1735_v22 = vunpack.i.h.bf16 %v1733_v19  ;;  %v36_v19 = vld [vmem:[%s2506_s2 + $0x18] sm:$0xff] }
 0x2f8   :  { %634 = vmatpush.msra.mxu2 %v36_v19 }
 0x2f9   :  { %363 = vmatpush.msrb.mxu1 %v1734_v21 }
 0x2fa   :  { %635 = vmatpush.msra.mxu2 %v35_v20 }
 0x2fb   :  { %364 = vmatpush.msrb.mxu1 %v1735_v22 }
 0x2fc   :  { %1628 = vmatmul.msk.f32.vlgmr.msrb.gmra.mxu1 %vm248_vm2, %v329_v23 }
 0x2fd   :  { %550 = vmatpush.msra.mxu1 %v1739_v33 }
 0x2ff   :  { %551 = vmatpush.msra.mxu1 %v1740_v32  ;;  %v48_v32 = vld [vmem:[%s2508_s4 + $0x8] sm:$0xff] }
 0x301   :  { %552 = vmatpush.msra.mxu1 %v1744_v36 }
 0x303   :  { %553 = vmatpush.msra.mxu1 %v1745_v35 }
 0x321   :  { %v302_v24 = vpop.xlane.xlu1 %301 }
 0x322   :  { %1806 = vrcp.f32 %v302_v24 }
 0x323   :  { %1808 = vrcp.f32 %v1914_v58 }
 0x328   :  { %v1807_v25 = vpop.eup %1806 }
 0x329   :  { %v330_v26 = vmul.f32 %v1807_v25, %v1793_v56  ;;  %v1809_v59 = vpop.eup %1808 }
 0x32a   :  { %v570_v60 = vmul.f32 32.0, %v1809_v59  ;;  %vm574_vm4 = vweird.f32 %v1809_v59 }
 0x32b   :  { %1629 = vmatmul.msk.f32.gmra.mxu1 %vm248_vm2, %v330_v26 }
 0x32c   :  { %v401_v27 = vpop.f32.mrf.mxu2  ;;  %v571_v61 = vsub.f32 1.0, %v570_v60 }
 0x32d   :  { %479 = vrot.lane.b32.xlu0 %v401_v27, %s1911_s17 }
 0x32e   :  { %v572_v62 = vmul.f32 %v1809_v59, %v571_v61  ;;  %v40_v61 = vld [vmem:[%s2507_s3 + $0x8] sm:$0xff] }
 0x330   :  { %v573_v3 = vadd.f32 %v1809_v59, %v572_v62 }
 0x334   :  { %v404_v28 = vpop.f32.mrf.mxu2 }
 0x335   :  { %481 = vrot.lane.b32.xlu2 %v404_v28, %s1911_s17 }
 0x336   :  { %v471_v29 = vpop.f32.mrf.mxu0 }
 0x337   :  { %495 = vrot.lane.b32.xlu1 %v471_v29, %s1912_s18 }
 0x343   :  { %v436_v30 = vpop.f32.mrf.mxu3 }
 0x344   :  { %487 = vrot.lane.b32.xlu0 %v436_v30, %s1913_s19 }
 0x363   :  { %v474_v37 = vpop.f32.mrf.mxu0 }
 0x364   :  { %497 = vrot.lane.b32.xlu2 %v474_v37, %s1912_s18 }
 0x36b   :  { %v439_v38 = vpop.f32.mrf.mxu3 }
 0x36c   :  { %489 = vrot.lane.b32.xlu0 %v439_v38, %s1913_s19  ;;  %528 = vrot.lane.b32.xlu2 %v2000_v12, %s1910_s16 }
 0x374   :  { %526 = vrot.lane.b32.xlu0 %v1992_v8, %s1910_s16 }
 0x379   :  { %v366_v40 = vpop.f32.mrf.mxu1 }
 0x38f   :  { %v482_v46 = vpop.permute.xlu2 %481 }
 0x39f   :  { %v480_v39 = vpop.permute.xlu0 %479 }
 0x3a0   :  { %v501_v41 = vsel %vm89_vm1, %v366_v40, %v480_v39 }
 0x3a8   :  { %v369_v47 = vpop.f32.mrf.mxu1 }
 0x3a9   :  { %v496_v43 = vpop.permute.xlu1 %495  ;;  %v502_v12 = vsel %vm89_vm1, %v369_v47, %v482_v46 }
 0x3b6   :  { %v488_v42 = vpop.permute.xlu0 %487 }
 0x3b7   :  { %v503_v44 = vsel %vm248_vm2, %v501_v41, %v488_v42 }
 0x3b8   :  { %v506_v45 = vsel %vm505_vm3, %v503_v44, %v496_v43 }
 0x3b9   :  { %1636 = vmatmul.msk.f32.vlgmr.msra.gmra.mxu1 %vm51_vm0, %v506_v45 }
 0x3be   :  { %v498_v50 = vpop.permute.xlu2 %497 }
 0x3c6   :  { %v529_v56 = vpop.permute.xlu2 %528 }
 0x3de   :  { %v490_v49 = vpop.permute.xlu0 %489 }
 0x3df   :  { %v504_v8 = vsel %vm248_vm2, %v502_v12, %v490_v49  ;;  %v46_v49 = vld [vmem:[%s2507_s3 + $0x38] sm:$0xff] }
 0x3e0   :  { %v507_v51 = vsel %vm505_vm3, %v504_v8, %v498_v50  ;;  %754 = vmatpush.msra.mxu3 %v46_v49 }
 0x3e1   :  { %1637 = vmatmul.msk.f32.gmra.mxu1 %vm51_vm0, %v507_v51  ;;  %v50_v51 = vld [vmem:[%s2508_s4 + $0x18] sm:$0xff] }
 0x3e6   :  { %v527_v52 = vpop.permute.xlu0 %526 }
 0x436   :  { %v555_v53 = vpop.f32.mrf.mxu1 }
 0x437   :  { %v556_v54 = vadd.f32 %v555_v53, %v527_v52  ;;  %v45_v52 = vld [vmem:[%s2507_s3 + $0x30] sm:$0xff] }
 0x438   :  { %755 = vmatpush.msra.mxu3 %v45_v52 }
 0x439   :  { %v561_v15 = vadd.f32 %v556_v54, %v1977_v6  ;;  %v2150_v6 = vsel %vm574_vm4, %v1809_v59, %v573_v3  ;;  %v41_v59 = vld [vmem:[%s2507_s3 + $0x10] sm:$0xff] }
 0x43b   :  { %v563_v55 = vsel %vm51_vm0, %v561_v15, 0.0 }
 0x43c   :  { %564 = vadd.xlane.f32.xlu0 %v563_v55 }
 0x45e   :  { %v558_v57 = vpop.f32.mrf.mxu1 }
 0x45f   :  { %v559_v0 = vadd.f32 %v558_v57, %v529_v56  ;;  %v43_v57 = vld [vmem:[%s2507_s3 + $0x20] sm:$0xff] }
 0x461   :  { %v562_v1 = vadd.f32 %v559_v0, %v1985_v7 }
 0x463   :  { %v566_v2 = vsel %vm51_vm0, %v562_v1, 0.0 }
 0x464   :  { %567 = vadd.xlane.f32.xlu1 %v566_v2 }
 0x47d   :  { %733 = vrot.lane.b32.xlu1 %v48_v32, %s1909_s15 }
 0x4af   :  { %v565_v4 = vpop.xlane.xlu0 %564 }
 0x4b0   :  { %v576_v5 = vmul.f32 %v2150_v6, %v565_v4  ;;  %v39_v4 = vld [vmem:[%s2507_s3] sm:$0xff] }
 0x4b2   :  { %v578_v63 = vsub.f32 %v561_v15, %v576_v5  ;;  %v44_v15 = vld [vmem:[%s2507_s3 + $0x28] sm:$0xff] }
 0x4b3   :  { %756 = vmatpush.msra.mxu3 %v44_v15 }
 0x4b4   :  { %v580_v9 = vmul.f32 %v578_v63, %v578_v63 }
 0x4b5   :  { %757 = vmatpush.msra.mxu3 %v43_v57 }
 0x4b6   :  { %v582_v7 = vsel %vm51_vm0, %v580_v9, 0.0 }
 0x4b7   :  { %583 = vadd.xlane.f32.xlu2 %v582_v7 }
 0x4cf   :  { %735 = vrot.lane.b32.xlu2 %v50_v51, %s1909_s15 }
 0x4d7   :  { %v568_v10 = vpop.xlane.xlu1 %567 }
 0x4d8   :  { %v577_v11 = vmul.f32 %v2150_v6, %v568_v10 }
 0x4da   :  { %v579_v13 = vsub.f32 %v562_v1, %v577_v11  ;;  %v42_v1 = vld [vmem:[%s2507_s3 + $0x18] sm:$0xff] }
 0x4db   :  { %758 = vmatpush.msra.mxu3 %v42_v1 }
 0x4dc   :  { %v581_v14 = vmul.f32 %v579_v13, %v579_v13 }
 0x4dd   :  { %759 = vmatpush.msra.mxu3 %v41_v59 }
 0x4de   :  { %v585_v16 = vsel %vm51_vm0, %v581_v14, 0.0 }
 0x4df   :  { %586 = vadd.xlane.f32.xlu0 %v585_v16  ;;  %760 = vmatpush.msra.mxu3 %v40_v61 }
 0x4e1   :  { %761 = vmatpush.msra.mxu3 %v39_v4 }
 0x52a   :  { %v584_v21 = vpop.xlane.xlu2 %583 }
 0x52b   :  { %v588_v22 = vmul.f32 %v584_v21, %v2150_v6 }
 0x52d   :  { %v590_v23 = vadd.f32 1e-05, %v588_v22 }
 0x52f   :  { %1810 = vrsqrt.f32 %v590_v23  ;;  %vm598_vm6 = vweird.f32 %v590_v23 }
 0x535   :  { %v1811_v24 = vpop.eup %1810 }
 0x536   :  { %v593_v25 = vmul.f32 %v1811_v24, %v590_v23  ;;  %vm599_vm5 = vweird.f32 %v1811_v24 }
 0x537   :  { %vm600_vm7 = vmor %vm598_vm6, %vm599_vm5 }
 0x538   :  { %v594_v26 = vmul.f32 %v1811_v24, %v593_v25 }
 0x53a   :  { %v595_v27 = vmul.f32 0.5, %v594_v26 }
 0x53c   :  { %v596_v28 = vsub.f32 1.5, %v595_v27 }
 0x53e   :  { %v597_v29 = vmul.f32 %v1811_v24, %v596_v28 }
 0x540   :  { %v601_v30 = vsel %vm600_vm7, %v1811_v24, %v597_v29 }
 0x541   :  { %v2169_v31 = vmul.f32 %v601_v30, %v578_v63 }
 0x543   :  { %1638 = vmatmul.msk.f32.vlgmr.msra.gmra.mxu2 %vm51_vm0, %v2169_v31 }
 0x552   :  { %v587_v33 = vpop.xlane.xlu0 %586 }
 0x553   :  { %v589_v34 = vmul.f32 %v587_v33, %v2150_v6 }
 0x555   :  { %v591_v35 = vadd.f32 1e-05, %v589_v34 }
 0x557   :  { %1812 = vrsqrt.f32 %v591_v35  ;;  %vm608_vm9 = vweird.f32 %v591_v35 }
 0x55d   :  { %v1813_v36 = vpop.eup %1812 }
 0x55e   :  { %v603_v37 = vmul.f32 %v1813_v36, %v591_v35  ;;  %vm609_vm8 = vweird.f32 %v1813_v36 }
 0x55f   :  { %vm610_vm10 = vmor %vm608_vm9, %vm609_vm8 }
 0x560   :  { %v604_v38 = vmul.f32 %v1813_v36, %v603_v37 }
 0x562   :  { %v605_v39 = vmul.f32 0.5, %v604_v38 }
 0x564   :  { %v606_v40 = vsub.f32 1.5, %v605_v39 }
 0x566   :  { %v607_v41 = vmul.f32 %v1813_v36, %v606_v40 }
 0x568   :  { %v611_v42 = vsel %vm610_vm10, %v1813_v36, %v607_v41 }
 0x569   :  { %v2178_v43 = vmul.f32 %v611_v42, %v579_v13 }
 0x56b   :  { %1639 = vmatmul.msk.f32.gmra.mxu2 %vm51_vm0, %v2178_v43 }
 0x5c6   :  { %v637_v44 = vpop.f32.mrf.mxu2 }
 0x5c7   :  { %v2182_v45 = vadd.f32 %v637_v44, %v48_v32 }
 0x5c9   :  { %v645_v46 = vmul.f32 0.70710677, %v2182_v45  ;;  %v643_v37 = vmul.f32 0.5, %v2182_v45 }
 0x5cb   :  { %v647_v47 = vmul.f32 %v645_v46, %v645_v46 }
 0x5cd   :  { %v648_v12 = vmin.f32 %v647_v47, 16.0 }
 0x5cf   :  { %v649_v50 = vmul.f32 2.1237322e-06, %v648_v12  ;;  %v660_v8 = vmul.f32 3.8918573e-05, %v648_v12 }
 0x5d1   :  { %v650_v53 = vadd.f32 0.00028619796, %v649_v50  ;;  %v661_v54 = vadd.f32 0.001143296, %v660_v8 }
 0x5d3   :  { %v651_v55 = vmul.f32 %v650_v53, %v648_v12  ;;  %v662_v56 = vmul.f32 %v661_v54, %v648_v12 }
 0x5d5   :  { %v663_v0 = vadd.f32 0.014752088, %v662_v56  ;;  %v652_v2 = vadd.f32 0.0036580483, %v651_v55 }
 0x5d7   :  { %v664_v58 = vmul.f32 %v663_v0, %v648_v12  ;;  %v653_v62 = vmul.f32 %v652_v2, %v648_v12 }
 0x5d9   :  { %v665_v60 = vadd.f32 0.112945676, %v664_v58  ;;  %v654_v63 = vadd.f32 0.05243302, %v653_v62 }
 0x5db   :  { %v666_v3 = vmul.f32 %v665_v60, %v648_v12  ;;  %v655_v10 = vmul.f32 %v654_v63, %v648_v12 }
 0x5dd   :  { %v667_v5 = vadd.f32 0.4994258, %v666_v3  ;;  %v656_v11 = vadd.f32 0.18741608, %v655_v10 }
 0x5df   :  { %v668_v9 = vmul.f32 %v667_v5, %v648_v12  ;;  %v657_v14 = vmul.f32 %v656_v11, %v648_v12  ;;  %v734_v11 = vpop.permute.xlu1 %733 }
 0x5e1   :  { %v669_v7 = vadd.f32 1.0, %v668_v9  ;;  %v658_v19 = vadd.f32 1.1283791, %v657_v14 }
 0x5e3   :  { %1814 = vrcp.f32 %v669_v7  ;;  %v681_v18 = vand.u32 2147483648, %v669_v7  ;;  %v679_v21 = vand.u32 2147483647, %v669_v7  ;;  %vm675_vm12 = vweird.f32 %v669_v7 }
 0x5e4   :  { %v659_v27 = vmul.f32 %v658_v19, %v645_v46 }
 0x5e5   :  { %v682_v25 = vor.u32 1.1754944e-38, %v681_v18  ;;  %vm680_vm14 = vcmp.eq.f32.partialorder %v679_v21, 8.507059e+37  ;;  %v736_v18 = vpop.permute.xlu2 %735 }
 0x5e9   :  { %v1815_v13 = vpop.eup %1814 }
 0x5ea   :  { %v671_v16 = vmul.f32 %v1815_v13, %v669_v7  ;;  %vm676_vm11 = vweird.f32 %v1815_v13 }
 0x5eb   :  { %vm677_vm13 = vmor %vm675_vm12, %vm676_vm11 }
 0x5ec   :  { %v672_v17 = vsub.f32 1.0, %v671_v16 }
 0x5ee   :  { %v673_v20 = vmul.f32 %v1815_v13, %v672_v17  ;;  %v640_v22 = vpop.f32.mrf.mxu2 }
 0x5ef   :  { %v641_v23 = vadd.f32 %v640_v22, %v50_v51 }
 0x5f0   :  { %v674_v24 = vadd.f32 %v1815_v13, %v673_v20 }
 0x5f1   :  { %v646_v26 = vmul.f32 0.70710677, %v641_v23  ;;  %v644_v9 = vmul.f32 0.5, %v641_v23 }
 0x5f2   :  { %v678_v28 = vsel %vm677_vm13, %v1815_v13, %v674_v24 }
 0x5f3   :  { %v683_v29 = vsel %vm680_vm14, %v682_v25, %v678_v28  ;;  %v687_v30 = vmul.f32 %v646_v26, %v646_v26 }
 0x5f4   :  { %v684_v32 = vmul.f32 %v683_v29, %v659_v27 }
 0x5f5   :  { %v688_v33 = vmin.f32 %v687_v30, 16.0 }
 0x5f6   :  { %v1640_v34 = vclamps-f32 %v684_v32, 1.0 }
 0x5f7   :  { %v689_v35 = vmul.f32 2.1237322e-06, %v688_v33  ;;  %v700_v36 = vmul.f32 3.8918573e-05, %v688_v33 }
 0x5f8   :  { %v727_v38 = vadd.f32 1.0, %v1640_v34  ;;  %v2239_v34 = vld [vmem:[%s2506_s2 + $0x50] sm:$0xff] }
 0x5f9   :  { %v690_v39 = vadd.f32 0.00028619796, %v689_v35  ;;  %v701_v40 = vadd.f32 0.001143296, %v700_v36  ;;  %v2247_v36 = vld [vmem:[%s2506_s2 + $0x40] sm:$0xff] }
 0x5fa   :  { %v729_v41 = vmul.f32 %v727_v38, %v643_v37  ;;  %v1771_v37 = vpack.i.bf16 %v2247_v36, %v2239_v34 }
 0x5fb   :  { %v691_v42 = vmul.f32 %v690_v39, %v688_v33  ;;  %v702_v44 = vmul.f32 %v701_v40, %v688_v33 }
 0x5fc   :  { %1642 = vmatmul.msk.f32.vlgmr.msra.gmra.mxu3 %vm739_vm15, %v729_v41 }
 0x5fd   :  { %v703_v46 = vadd.f32 0.014752088, %v702_v44  ;;  %v692_v47 = vadd.f32 0.0036580483, %v691_v42 }
 0x5ff   :  { %v704_v12 = vmul.f32 %v703_v46, %v688_v33  ;;  %v693_v50 = vmul.f32 %v692_v47, %v688_v33 }
 0x601   :  { %v705_v49 = vadd.f32 0.112945676, %v704_v12  ;;  %v694_v52 = vadd.f32 0.05243302, %v693_v50 }
 0x603   :  { %v706_v8 = vmul.f32 %v705_v49, %v688_v33  ;;  %v695_v45 = vmul.f32 %v694_v52, %v688_v33 }
 0x605   :  { %v707_v51 = vadd.f32 0.4994258, %v706_v8  ;;  %v696_v15 = vadd.f32 0.18741608, %v695_v45 }
 0x607   :  { %v708_v53 = vmul.f32 %v707_v51, %v688_v33  ;;  %v697_v56 = vmul.f32 %v696_v15, %v688_v33  ;;  %v2233_v33 = vld [vmem:[%s2506_s2 + $0x60] sm:$0xff] }
 0x609   :  { %v709_v54 = vadd.f32 1.0, %v708_v53  ;;  %v698_v2 = vadd.f32 1.1283791, %v697_v56 }
 0x60b   :  { %1816 = vrcp.f32 %v709_v54  ;;  %v721_v1 = vand.u32 2147483648, %v709_v54  ;;  %v719_v59 = vand.u32 2147483647, %v709_v54  ;;  %vm715_vm5 = vweird.f32 %v709_v54 }
 0x60c   :  { %v699_v62 = vmul.f32 %v698_v2, %v646_v26 }
 0x60d   :  { %v722_v61 = vor.u32 1.1754944e-38, %v721_v1  ;;  %vm720_vm7 = vcmp.eq.f32.partialorder %v719_v59, 8.507059e+37  ;;  %v2265_v1 = vld [vmem:[%s2508_s4 + $0x20] sm:$0xff] }
 0x611   :  { %v1817_v55 = vpop.eup %1816 }
 0x612   :  { %v711_v57 = vmul.f32 %v1817_v55, %v709_v54  ;;  %vm716_vm4 = vweird.f32 %v1817_v55 }
 0x613   :  { %vm717_vm6 = vmor %vm715_vm5, %vm716_vm4 }
 0x614   :  { %v712_v0 = vsub.f32 1.0, %v711_v57 }
 0x616   :  { %v713_v58 = vmul.f32 %v1817_v55, %v712_v0 }
 0x618   :  { %v714_v60 = vadd.f32 %v1817_v55, %v713_v58 }
 0x61a   :  { %v718_v3 = vsel %vm717_vm6, %v1817_v55, %v714_v60  ;;  %v2281_v60 = vld [vmem:[%s2508_s4 + $0x30] sm:$0xff] }
 0x61b   :  { %v723_v4 = vsel %vm720_vm7, %v722_v61, %v718_v3 }
 0x61c   :  { %v724_v5 = vmul.f32 %v723_v4, %v699_v62 }
 0x61e   :  { %v1641_v63 = vclamps-f32 %v724_v5, 1.0 }
 0x620   :  { %v728_v7 = vadd.f32 1.0, %v1641_v63 }
 0x622   :  { %v730_v10 = vmul.f32 %v728_v7, %v644_v9 }
 0x624   :  { %1643 = vmatmul.msk.f32.gmra.mxu3 %vm739_vm15, %v730_v10 }
 0x67f   :  { %v763_v13 = vpop.f32.mrf.mxu3 }
 0x680   :  { %v764_v14 = vadd.f32 %v763_v13, %v734_v11 }
 0x682   :  { %v769_v16 = vadd.f32 %v764_v14, %v2169_v31 }
 0x684   :  { %v771_v17 = vsel %vm51_vm0, %v769_v16, 0.0 }
 0x685   :  { %772 = vadd.xlane.f32.xlu0 %v771_v17 }
 0x6a7   :  { %v766_v19 = vpop.f32.mrf.mxu3 }
 0x6a8   :  { %v767_v20 = vadd.f32 %v766_v19, %v736_v18 }
 0x6aa   :  { %v770_v21 = vadd.f32 %v767_v20, %v2178_v43  ;;  %v2227_v43 = vld [vmem:[%s2506_s2 + $0x70] sm:$0xff] }
 0x6ab   :  { %856 = vmatpush.msrb.mxu0 %v2227_v43  ;;  %v1766_v35 = vpack.i.bf16 %v2233_v33, %v2227_v43 }
 0x6ac   :  { %v774_v22 = vsel %vm51_vm0, %v770_v21, 0.0 }
 0x6ad   :  { %775 = vadd.xlane.f32.xlu0 %v774_v22  ;;  %857 = vmatpush.msrb.mxu0 %v2233_v33  ;;  %v1866_v22 = vld [vmem:[%s2505_s1 + $0x20] sm:$0xff] }
 0x6af   :  { %858 = vmatpush.msrb.mxu0 %v2239_v34 }
 0x6b1   :  { %859 = vmatpush.msrb.mxu0 %v2247_v36 }
 0x6f8   :  { %v773_v23 = vpop.xlane.xlu0 %772 }
 0x6f9   :  { %v777_v24 = vmul.f32 %v773_v23, %v2150_v6 }
 0x6fb   :  { %v779_v25 = vsub.f32 %v769_v16, %v777_v24 }
 0x6fd   :  { %v781_v26 = vmul.f32 %v779_v25, %v779_v25 }
 0x6ff   :  { %v783_v27 = vsel %vm51_vm0, %v781_v26, 0.0 }
 0x700   :  { %784 = vadd.xlane.f32.xlu0 %v783_v27 }
 0x720   :  { %v776_v31 = vpop.xlane.xlu0 %775 }
 0x721   :  { %v778_v28 = vmul.f32 %v776_v31, %v2150_v6 }
 0x723   :  { %v780_v29 = vsub.f32 %v770_v21, %v778_v28 }
 0x725   :  { %v782_v30 = vmul.f32 %v780_v29, %v780_v29 }
 0x727   :  { %v786_v32 = vsel %vm51_vm0, %v782_v30, 0.0 }
 0x728   :  { %787 = vadd.xlane.f32.xlu1 %v786_v32 }
 0x773   :  { %v785_v38 = vpop.xlane.xlu0 %784 }
 0x774   :  { %v789_v39 = vmul.f32 %v785_v38, %v2150_v6 }
 0x776   :  { %v791_v40 = vadd.f32 1e-05, %v789_v39 }
 0x778   :  { %1818 = vrsqrt.f32 %v791_v40  ;;  %vm799_vm9 = vweird.f32 %v791_v40 }
 0x77e   :  { %v1819_v41 = vpop.eup %1818 }
 0x77f   :  { %v794_v42 = vmul.f32 %v1819_v41, %v791_v40  ;;  %vm800_vm8 = vweird.f32 %v1819_v41 }
 0x780   :  { %vm801_vm10 = vmor %vm799_vm9, %vm800_vm8 }
 0x781   :  { %v795_v44 = vmul.f32 %v1819_v41, %v794_v42  ;;  %v1869_v42 = vld [vmem:[%s2505_s1 + $0x38] sm:$0xff] }
 0x783   :  { %v796_v46 = vmul.f32 0.5, %v795_v44 }
 0x785   :  { %v797_v47 = vsub.f32 1.5, %v796_v46 }
 0x787   :  { %v798_v12 = vmul.f32 %v1819_v41, %v797_v47 }
 0x789   :  { %v802_v49 = vsel %vm801_vm10, %v1819_v41, %v798_v12 }
 0x78a   :  { %v2253_v50 = vmul.f32 %v802_v49, %v779_v25  ;;  %v1867_v25 = vld [vmem:[%s2505_s1 + $0x30] sm:$0xff] }
 0x78c   :  { %1664 = vmatmul.msk.f32.vlgmr.msrb.gmra.mxu0 %vm51_vm0, %v2253_v50 }
 0x79b   :  { %v788_v8 = vpop.xlane.xlu1 %787 }
 0x79c   :  { %v790_v51 = vmul.f32 %v788_v8, %v2150_v6 }
 0x79e   :  { %v792_v52 = vadd.f32 1e-05, %v790_v51  ;;  %v1871_v51 = vld [vmem:[%s2505_s1 + $0x18] sm:$0xff] }
 0x7a0   :  { %1820 = vrsqrt.f32 %v792_v52  ;;  %vm809_vm12 = vweird.f32 %v792_v52 }
 0x7a6   :  { %v1821_v53 = vpop.eup %1820 }
 0x7a7   :  { %v804_v54 = vmul.f32 %v1821_v53, %v792_v52  ;;  %vm810_vm11 = vweird.f32 %v1821_v53 }
 0x7a8   :  { %vm811_vm13 = vmor %vm809_vm12, %vm810_vm11 }
 0x7a9   :  { %v805_v45 = vmul.f32 %v1821_v53, %v804_v54  ;;  %v1872_v54 = vld [vmem:[%s2505_s1 + $0x8] sm:$0xff] }
 0x7ab   :  { %v806_v15 = vmul.f32 0.5, %v805_v45 }
 0x7ad   :  { %v807_v55 = vsub.f32 1.5, %v806_v15 }
 0x7af   :  { %v808_v56 = vmul.f32 %v1821_v53, %v807_v55 }
 0x7b1   :  { %v812_v57 = vsel %vm811_vm13, %v1821_v53, %v808_v56 }
 0x7b2   :  { %v2258_v0 = vmul.f32 %v812_v57, %v780_v29  ;;  %v1868_v29 = vld [vmem:[%s2505_s1 + $0x10] sm:$0xff] }
 0x7b4   :  { %1665 = vmatmul.msk.f32.gmra.mxu0 %vm51_vm0, %v2258_v0 }
 0x809   :  { %v861_v2 = vpop.f32.mrf.mxu0 }
 0x80a   :  { %v2268_v58 = vadd.f32 %v2265_v1, %v861_v2 }
 0x80c   :  { %990 = vrot.lane.b32.xlu1 %v2268_v58, %s1903_s12  ;;  %912 = vrot.lane.b32.xlu2 %v2268_v58, %s1899_s7  ;;  %v867_v59 = vmul.f32 0.35355338, %v2268_v58 }
 0x80e   :  { %908 = vrot.lane.b32.xlu0 %v867_v59, %s1900_s8 }
 0x814   :  { %951 = vrot.lane.b32.xlu2 %v2268_v58, %s1901_s10 }
 0x831   :  { %v864_v61 = vpop.f32.mrf.mxu0 }
 0x832   :  { %v2284_v62 = vadd.f32 %v2281_v60, %v864_v61 }
 0x834   :  { %914 = vrot.lane.b32.xlu2 %v2284_v62, %s1899_s7  ;;  %953 = vrot.lane.b32.xlu0 %v2284_v62, %s1901_s10  ;;  %v868_v3 = vmul.f32 0.35355338, %v2284_v62 }
 0x83c   :  { %947 = vrot.lane.b32.xlu2 %v867_v59, %s1902_s11  ;;  %992 = vrot.lane.b32.xlu0 %v2284_v62, %s1903_s12 }
 0x844   :  { %910 = vrot.lane.b32.xlu2 %v868_v3, %s1900_s8  ;;  %949 = vrot.lane.b32.xlu0 %v868_v3, %s1902_s11 }
 0x84c   :  { %986 = vrot.lane.b32.xlu2 %v867_v59, %s1904_s13  ;;  %988 = vrot.lane.b32.xlu0 %v868_v3, %s1904_s13 }
 0x854   :  { %873 = vrot.lane.b32.xlu2 %v2284_v62, %s1905_s14  ;;  %871 = vrot.lane.b32.xlu0 %v2268_v58, %s1905_s14 }
 0x866   :  { %v913_v4 = vpop.permute.xlu2 %912 }
 0x86e   :  { %v952_v5 = vpop.permute.xlu2 %951 }
 0x87e   :  { %v991_v17 = vpop.permute.xlu1 %990 }
 0x880   :  { %v909_v9 = vpop.permute.xlu0 %908 }
 0x88e   :  { %v915_v63 = vpop.permute.xlu2 %914 }
 0x88f   :  { %1670 = vmatpush.xpose.msk.msrb.mxu2 %vm89_vm1, %v915_v63 }
 0x893   :  { %1671 = vmatpush.xpose.msk.msrb.mxu2 %vm89_vm1, %v913_v4 }
 0x896   :  { %v948_v7 = vpop.permute.xlu2 %947  ;;  %1672 = vmatmul.msk.f32.vlgmr.msrb.gmra.mxu2 %vm89_vm1, %v909_v9 }
 0x89e   :  { %v911_v10 = vpop.permute.xlu2 %910 }
 0x89f   :  { %1673 = vmatmul.msk.f32.gmra.mxu2 %vm89_vm1, %v911_v10 }
 0x8a6   :  { %v987_v11 = vpop.permute.xlu2 %986  ;;  %v954_v13 = vpop.permute.xlu0 %953 }
 0x8a7   :  { %1674 = vmatpush.xpose.msk.msrb.mxu3 %vm89_vm1, %v954_v13 }
 0x8ab   :  { %1675 = vmatpush.xpose.msk.msrb.mxu3 %vm89_vm1, %v952_v5 }
 0x8ae   :  { %v874_v14 = vpop.permute.xlu2 %873  ;;  %1676 = vmatmul.msk.f32.vlgmr.msrb.gmra.mxu3 %vm89_vm1, %v948_v7  ;;  %v993_v16 = vpop.permute.xlu0 %992 }
 0x8af   :  { %1666 = vmatpush.xpose.msk.msrb.mxu1 %vm89_vm1, %v874_v14  ;;  %1678 = vmatpush.xpose.msk.msra.mxu0 %vm89_vm1, %v993_v16 }
 0x8b3   :  { %1679 = vmatpush.xpose.msk.msra.mxu0 %vm89_vm1, %v991_v17 }
 0x8b6   :  { %1680 = vmatmul.msk.f32.vlgmr.msra.gmra.mxu0 %vm89_vm1, %v987_v11  ;;  %v950_v18 = vpop.permute.xlu0 %949 }
 0x8b7   :  { %1677 = vmatmul.msk.f32.gmra.mxu3 %vm89_vm1, %v950_v18 }
 0x8be   :  { %v989_v19 = vpop.permute.xlu0 %988 }
 0x8bf   :  { %1681 = vmatmul.msk.f32.gmra.mxu0 %vm89_vm1, %v989_v19 }
 0x8c6   :  { %v872_v20 = vpop.permute.xlu0 %871 }
 0x8c7   :  { %1667 = vmatpush.xpose.msk.msrb.mxu1 %vm89_vm1, %v872_v20 }
 0x8ca   :  { %1668 = vmatmul.msk.f32.vlgmr.msrb.gmra.mxu1 %vm89_vm1, %v867_v59 }
 0x8d2   :  { %1669 = vmatmul.msk.f32.gmra.mxu1 %vm89_vm1, %v868_v3 }
 0x919   :  { %v941_v28 = vpop.f32.mrf.mxu2 }
 0x91a   :  { %v1027_v30 = vadd.f32 %v1868_v29, %v941_v28 }
 0x91c   :  { %v1039_v40 = vsel %vm248_vm2, %v1027_v30, -inf }
 0x922   :  { %v944_v8 = vpop.f32.mrf.mxu2 }
 0x923   :  { %v1028_v52 = vadd.f32 %v1871_v51, %v944_v8 }
 0x925   :  { %v1042_v15 = vsel %vm248_vm2, %v1028_v52, -inf }
 0x931   :  { %v980_v21 = vpop.f32.mrf.mxu3 }
 0x932   :  { %v1029_v23 = vadd.f32 %v1866_v22, %v980_v21  ;;  %v1746_v21 = vpack.i.bf16 %v2268_v58, %v2284_v62 }
 0x933   :  { %v1019_v24 = vpop.f32.mrf.mxu0 }
 0x934   :  { %v1031_v26 = vadd.f32 %v1867_v25, %v1019_v24  ;;  %v1045_v27 = vsel %vm248_vm2, %v1029_v23, -inf }
 0x935   :  { %1046 = vmax.xlane.f32.xlu0 %v1045_v27 }
 0x936   :  { %v1051_v31 = vsel %vm248_vm2, %v1031_v26, -inf }
 0x937   :  { %1052 = vmax.xlane.f32.xlu2 %v1051_v31 }
 0x93a   :  { %v983_v32 = vpop.f32.mrf.mxu3 }
 0x93b   :  { %v2330_v38 = vadd.f32 %v983_v32, %v2058_v48  ;;  %v1870_v48 = vld [vmem:[%s2505_s1] sm:$0xff] }
 0x93c   :  { %v1022_v41 = vpop.f32.mrf.mxu0 }
 0x93d   :  { %v1048_v39 = vsel %vm248_vm2, %v2330_v38, -inf  ;;  %v1032_v44 = vadd.f32 %v1869_v42, %v1022_v41 }
 0x93e   :  { %1049 = vmax.xlane.f32.xlu0 %v1048_v39 }
 0x93f   :  { %1040 = vmax.xlane.f32.xlu2 %v1039_v40  ;;  %v1054_v46 = vsel %vm248_vm2, %v1032_v44, -inf }
 0x947   :  { %1055 = vmax.xlane.f32.xlu2 %v1054_v46  ;;  %v902_v47 = vpop.f32.mrf.mxu1 }
 0x948   :  { %v1025_v12 = vadd.f32 %v1870_v48, %v902_v47 }
 0x94a   :  { %v1033_v49 = vsel %vm248_vm2, %v1025_v12, -inf }
 0x94b   :  { %1034 = vmax.xlane.f32.xlu1 %v1033_v49 }
 0x94f   :  { %v905_v53 = vpop.f32.mrf.mxu1 }
 0x950   :  { %v2349_v45 = vadd.f32 %v1872_v54, %v905_v53 }
 0x952   :  { %v1036_v55 = vsel %vm248_vm2, %v2349_v45, -inf }
 0x953   :  { %1043 = vmax.xlane.f32.xlu1 %v1042_v15  ;;  %1037 = vmax.xlane.f32.xlu2 %v1036_v55 }
 0x9a8   :  { %v1047_v56 = vpop.xlane.xlu0 %1046 }
 0x9a9   :  { %v1061_v59 = vsub.f32 %v1029_v23, %v1047_v56 }
 0x9aa   :  { %v1053_v57 = vpop.xlane.xlu2 %1052 }
 0x9ab   :  { %v1063_v2 = vsub.f32 %v1031_v26, %v1053_v57  ;;  %v1073_v3 = vmul.f32 1.442695, %v1061_v59 }
 0x9ad   :  { %v1077_v61 = vmul.f32 1.442695, %v1063_v2 }
 0x9af   :  { %1822 = vpow2.f32 %v1077_v61 }
 0x9b0   :  { %1824 = vpow2.f32 %v1073_v3 }
 0x9b1   :  { %v1050_v25 = vpop.xlane.xlu0 %1049 }
 0x9b2   :  { %v1041_v4 = vpop.xlane.xlu2 %1040  ;;  %v1062_v27 = vsub.f32 %v2330_v38, %v1050_v25 }
 0x9b3   :  { %v1059_v5 = vsub.f32 %v1027_v30, %v1041_v4 }
 0x9b4   :  { %v1075_v31 = vmul.f32 1.442695, %v1062_v27 }
 0x9b5   :  { %v2354_v63 = vpop.eup %1822  ;;  %v1069_v9 = vmul.f32 1.442695, %v1059_v5 }
 0x9b6   :  { %v1099_v7 = vsel %vm248_vm2, %v2354_v63, 0.0  ;;  %v2358_v10 = vpop.eup %1824 }
 0x9b7   :  { %1826 = vpow2.f32 %v1069_v9  ;;  %1100 = vadd.xlane.f32.xlu1 %v1099_v7  ;;  %v1093_v16 = vsel %vm248_vm2, %v2358_v10, 0.0 }
 0x9ba   :  { %v1056_v23 = vpop.xlane.xlu2 %1055 }
 0x9bb   :  { %v1064_v24 = vsub.f32 %v1032_v44, %v1056_v23 }
 0x9bd   :  { %v1827_v11 = vpop.eup %1826  ;;  %v1079_v26 = vmul.f32 1.442695, %v1064_v24 }
 0x9be   :  { %v1035_v13 = vpop.xlane.xlu1 %1034  ;;  %v1087_v14 = vsel %vm248_vm2, %v1827_v11, 0.0 }
 0x9bf   :  { %1088 = vadd.xlane.f32.xlu0 %v1087_v14  ;;  %1094 = vadd.xlane.f32.xlu1 %v1093_v16  ;;  %v1057_v30 = vsub.f32 %v1025_v12, %v1035_v13 }
 0x9c1   :  { %v1065_v32 = vmul.f32 1.442695, %v1057_v30 }
 0x9c6   :  { %v1044_v17 = vpop.xlane.xlu1 %1043  ;;  %v1038_v40 = vpop.xlane.xlu2 %1037 }
 0x9c7   :  { %v1060_v18 = vsub.f32 %v1028_v52, %v1044_v17  ;;  %v1058_v41 = vsub.f32 %v2349_v45, %v1038_v40 }
 0x9c9   :  { %v1071_v19 = vmul.f32 1.442695, %v1060_v18  ;;  %v1067_v42 = vmul.f32 1.442695, %v1058_v41 }
 0x9cb   :  { %1828 = vpow2.f32 %v1071_v19 }
 0x9cc   :  { %1830 = vpow2.f32 %v1079_v26 }
 0x9cd   :  { %1832 = vpow2.f32 %v1075_v31 }
 0x9ce   :  { %1834 = vpow2.f32 %v1065_v32 }
 0x9cf   :  { %1836 = vpow2.f32 %v1067_v42 }
 0x9d1   :  { %v2363_v20 = vpop.eup %1828 }
 0x9d2   :  { %v1090_v22 = vsel %vm248_vm2, %v2363_v20, 0.0  ;;  %v1831_v58 = vpop.eup %1830 }
 0x9d3   :  { %1747 = vrot.lane.b32.xlu0 %v1746_v21, %s1906_s6  ;;  %1091 = vadd.xlane.f32.xlu2 %v1090_v22  ;;  %v1102_v62 = vsel %vm248_vm2, %v1831_v58, 0.0  ;;  %v1833_v28 = vpop.eup %1832 }
 0x9d4   :  { %v1096_v29 = vsel %vm248_vm2, %v1833_v28, 0.0  ;;  %v2375_v39 = vpop.eup %1834 }
 0x9d5   :  { %v1081_v38 = vsel %vm248_vm2, %v2375_v39, 0.0  ;;  %v1837_v43 = vpop.eup %1836 }
 0x9d8   :  { %1757 = vrot.lane.b32.xlu1 %v1746_v21, %s1907_s0 }
 0x9eb   :  { %1752 = vrot.lane.b32.xlu2 %v1746_v21, %s1908_s9  ;;  %s1598_s9 = sshll.u32 %s2509_s5, 4  ;;  %s1599_s9 = int_to_ptr.hbm [resolvable:$true] %s1598_s9 }
 0x9fd   :  { %1103 = vadd.xlane.f32.xlu0 %v1102_v62 }
 0xa02   :  { %1097 = vadd.xlane.f32.xlu1 %v1096_v29 }
 0xa11   :  { %1767 = vrot.lane.b32.xlu0 %v1766_v35, %s1910_s16  ;;  %v1084_v35 = vsel %vm248_vm2, %v1837_v43, 0.0 }
 0xa14   :  { %1082 = vadd.xlane.f32.xlu2 %v1081_v38 }
 0xa19   :  { %1772 = vrot.lane.b32.xlu0 %v1771_v37, %s1910_s16 }
 0xa1b   :  { %1762 = vrot.lane.b32.xlu1 %v1746_v21, %s1909_s15 }
 0xa2a   :  { %v1101_v44 = vpop.xlane.xlu1 %1100 }
 0xa32   :  { %v1089_v46 = vpop.xlane.xlu0 %1088  ;;  %v1095_v33 = vpop.xlane.xlu1 %1094 }
 0xa33   :  { %1838 = vrcp.f32 %v1089_v46 }
 0xa34   :  { %1840 = vrcp.f32 %v1101_v44 }
 0xa39   :  { %v1839_v48 = vpop.eup %1838 }
 0xa3a   :  { %v1115_v12 = vmul.f32 %v1839_v48, %v1827_v11  ;;  %v1841_v8 = vpop.eup %1840 }
 0xa3b   :  { %v1119_v54 = vmul.f32 %v1841_v8, %v2354_v63 }
 0xa45   :  { %1085 = vadd.xlane.f32.xlu1 %v1084_v35  ;;  %v1748_v47 = vpop.permute.xlu0 %1747 }
 0xa46   :  { %v1749_v34 = vunpack.i.l.bf16 %v1748_v47  ;;  %v1092_v36 = vpop.xlane.xlu2 %1091  ;;  %v1750_v37 = vunpack.i.h.bf16 %v1748_v47 }
 0xa47   :  { %1842 = vrcp.f32 %v1092_v36 }
 0xa48   :  { %1182 = vmatpush.msra.mxu2 %v1749_v34  ;;  %1844 = vrcp.f32 %v1095_v33 }
 0xa4a   :  { %v1758_v49 = vpop.permute.xlu1 %1757  ;;  %1183 = vmatpush.msra.mxu2 %v1750_v37 }
 0xa4b   :  { %v1759_v51 = vunpack.i.l.bf16 %v1758_v49  ;;  %1684 = vmatmul.msk.f32.vlgmr.msra.gmra.mxu2 %vm248_vm2, %v1115_v12  ;;  %v1760_v52 = vunpack.i.h.bf16 %v1758_v49 }
 0xa4d   :  { %1252 = vmatpush.msrb.mxu0 %v1759_v51  ;;  %v1843_v53 = vpop.eup %1842 }
 0xa4e   :  { %v1753_v45 = vpop.permute.xlu2 %1752  ;;  %v1845_v15 = vpop.eup %1844  ;;  %v1116_v57 = vmul.f32 %v1843_v53, %v2363_v20 }
 0xa4f   :  { %v1754_v55 = vunpack.i.l.bf16 %v1753_v45  ;;  %1253 = vmatpush.msrb.mxu0 %v1760_v52  ;;  %v1755_v56 = vunpack.i.h.bf16 %v1753_v45  ;;  %v1117_v2 = vmul.f32 %v1845_v15, %v2358_v10 }
 0xa50   :  { %1688 = vmatmul.msk.f32.vlgmr.msrb.gmra.mxu0 %vm248_vm2, %v1119_v54 }
 0xa51   :  { %1217 = vmatpush.msra.mxu3 %v1754_v55 }
 0xa53   :  { %1685 = vmatmul.msk.f32.gmra.mxu2 %vm248_vm2, %v1116_v57  ;;  %1218 = vmatpush.msra.mxu3 %v1755_v56 }
 0xa54   :  { %1686 = vmatmul.msk.f32.vlgmr.msra.gmra.mxu3 %vm248_vm2, %v1117_v2  ;;  %v1650_v2 = vld [vmem:[%s2506_s2 + $0x68] sm:$0xff] }
 0xa70   :  { %v1104_v59 = vpop.xlane.xlu0 %1103 }
 0xa71   :  { %1846 = vrcp.f32 %v1104_v59  ;;  %v1649_v59 = vld [vmem:[%s2506_s2 + $0x58] sm:$0xff] }
 0xa75   :  { %v1098_v61 = vpop.xlane.xlu1 %1097 }
 0xa76   :  { %1848 = vrcp.f32 %v1098_v61  ;;  %v1648_v61 = vld [vmem:[%s2506_s2 + $0x48] sm:$0xff] }
 0xa77   :  { %v1847_v3 = vpop.eup %1846 }
 0xa78   :  { %v1120_v4 = vmul.f32 %v1847_v3, %v1831_v58 }
 0xa7a   :  { %1689 = vmatmul.msk.f32.gmra.mxu0 %vm248_vm2, %v1120_v4 }
 0xa7c   :  { %v1849_v5 = vpop.eup %1848 }
 0xa7d   :  { %v1118_v63 = vmul.f32 %v1849_v5, %v1833_v28 }
 0xa7f   :  { %1687 = vmatmul.msk.f32.gmra.mxu3 %vm248_vm2, %v1118_v63 }
 0xa83   :  { %v1768_v25 = vpop.permute.xlu0 %1767 }
 0xa84   :  { %v1770_v26 = vunpack.i.h.bf16 %v1768_v25  ;;  %v1769_v27 = vunpack.i.l.bf16 %v1768_v25 }
 0xa87   :  { %v1083_v9 = vpop.xlane.xlu2 %1082 }
 0xa88   :  { %1850 = vrcp.f32 %v1083_v9 }
 0xa8b   :  { %v1773_v31 = vpop.permute.xlu0 %1772 }
 0xa8c   :  { %v1775_v58 = vunpack.i.h.bf16 %v1773_v31  ;;  %v1774_v62 = vunpack.i.l.bf16 %v1773_v31 }
 0xa8d   :  { %v1763_v7 = vpop.permute.xlu1 %1762 }
 0xa8e   :  { %v1851_v10 = vpop.eup %1850  ;;  %v1764_v11 = vunpack.i.l.bf16 %v1763_v7  ;;  %v1765_v13 = vunpack.i.h.bf16 %v1763_v7 }
 0xa8f   :  { %v1113_v14 = vmul.f32 %v1851_v10, %v2375_v39 }
 0xa90   :  { %1147 = vmatpush.msra.mxu1 %v1764_v11 }
 0xa92   :  { %1148 = vmatpush.msra.mxu1 %v1765_v13 }
 0xa93   :  { %1682 = vmatmul.msk.f32.vlgmr.msra.gmra.mxu1 %vm248_vm2, %v1113_v14 }
 0xa94   :  { %1333 = vmatpush.msrb.mxu1 %v1769_v27 }
 0xa96   :  { %1334 = vmatpush.msrb.mxu1 %v1770_v26 }
 0xa98   :  { %1335 = vmatpush.msrb.mxu1 %v1774_v62 }
 0xa9a   :  { %1336 = vmatpush.msrb.mxu1 %v1775_v58 }
 0xab8   :  { %v1086_v16 = vpop.xlane.xlu1 %1085 }
 0xab9   :  { %1852 = vrcp.f32 %v1086_v16 }
 0xabf   :  { %v1853_v17 = vpop.eup %1852 }
 0xac0   :  { %v1114_v18 = vmul.f32 %v1853_v17, %v1837_v43  ;;  %v1661_v17 = vld [vmem:[%s2508_s4 + $0x28] sm:$0xff] }
 0xac2   :  { %1683 = vmatmul.msk.f32.gmra.mxu1 %vm248_vm2, %v1114_v18 }
 0xacd   :  { %v1255_v19 = vpop.f32.mrf.mxu0 }
 0xace   :  { %1279 = vrot.lane.b32.xlu1 %v1255_v19, %s1912_s18  ;;  %v1185_v20 = vpop.f32.mrf.mxu2 }
 0xacf   :  { %1263 = vrot.lane.b32.xlu2 %v1185_v20, %s1911_s17 }
 0xad6   :  { %v1188_v21 = vpop.f32.mrf.mxu2 }
 0xad7   :  { %v1220_v22 = vpop.f32.mrf.mxu3  ;;  %1265 = vrot.lane.b32.xlu2 %v1188_v21, %s1911_s17 }
 0xad8   :  { %1271 = vrot.lane.b32.xlu0 %v1220_v22, %s1913_s19 }
 0xaf7   :  { %v1258_v23 = vpop.f32.mrf.mxu0 }
 0xaf8   :  { %1281 = vrot.lane.b32.xlu2 %v1258_v23, %s1912_s18 }
 0xb00   :  { %1311 = vrot.lane.b32.xlu2 %v2281_v60, %s1910_s16 }
 0xb02   :  { %v1223_v24 = vpop.f32.mrf.mxu3 }
 0xb03   :  { %1273 = vrot.lane.b32.xlu0 %v1223_v24, %s1913_s19 }
 0xb0b   :  { %1309 = vrot.lane.b32.xlu0 %v2265_v1, %s1910_s16  ;;  %s1916_s16 = smov 128  }
 0xb10   :  { %v1150_v29 = vpop.f32.mrf.mxu1 }
 0xb29   :  { %v1264_v28 = vpop.permute.xlu2 %1263 }
 0xb2a   :  { %v1285_v60 = vsel %vm89_vm1, %v1150_v29, %v1264_v28 }
 0xb31   :  { %v1266_v38 = vpop.permute.xlu2 %1265 }
 0xb3f   :  { %v1153_v40 = vpop.f32.mrf.mxu1 }
 0xb40   :  { %v1280_v32 = vpop.permute.xlu1 %1279  ;;  %v1286_v41 = vsel %vm89_vm1, %v1153_v40, %v1266_v38 }
 0xb4a   :  { %v1272_v30 = vpop.permute.xlu0 %1271 }
 0xb4b   :  { %v1287_v39 = vsel %vm248_vm2, %v1285_v60, %v1272_v30  ;;  %v1659_v30 = vld [vmem:[%s2507_s3 + $0x78] sm:$0xff] }
 0xb4c   :  { %v1289_v1 = vsel %vm505_vm3, %v1287_v39, %v1280_v32  ;;  %1529 = vmatpush.msrb.mxu3 %v1659_v30 }
 0xb4d   :  { %1690 = vmatmul.msk.f32.vlgmr.msrb.gmra.mxu1 %vm51_vm0, %v1289_v1  ;;  %v1658_v1 = vld [vmem:[%s2507_s3 + $0x70] sm:$0xff] }
 0xb4e   :  { %1530 = vmatpush.msrb.mxu3 %v1658_v1 }
 0xb52   :  { %v1282_v44 = vpop.permute.xlu2 %1281 }
 0xb5a   :  { %v1312_v36 = vpop.permute.xlu2 %1311 }
 0xb75   :  { %v1274_v42 = vpop.permute.xlu0 %1273 }
 0xb76   :  { %v1288_v46 = vsel %vm248_vm2, %v1286_v41, %v1274_v42  ;;  %v1657_v41 = vld [vmem:[%s2507_s3 + $0x68] sm:$0xff]  ;;  %v1663_v42 = vld [vmem:[%s2508_s4 + $0x38] sm:$0xff] }
 0xb77   :  { %v1290_v43 = vsel %vm505_vm3, %v1288_v46, %v1282_v44  ;;  %1531 = vmatpush.msrb.mxu3 %v1657_v41 }
 0xb78   :  { %1691 = vmatmul.msk.f32.gmra.mxu1 %vm51_vm0, %v1290_v43  ;;  %v1656_v43 = vld [vmem:[%s2507_s3 + $0x60] sm:$0xff] }
 0xb79   :  { %1532 = vmatpush.msrb.mxu3 %v1656_v43 }
 0xb7d   :  { %v1310_v33 = vpop.permute.xlu0 %1309 }
 0xbca   :  { %v1338_v35 = vpop.f32.mrf.mxu1 }
 0xbcb   :  { %v1339_v47 = vadd.f32 %v1338_v35, %v1310_v33  ;;  %v1655_v35 = vld [vmem:[%s2507_s3 + $0x58] sm:$0xff] }
 0xbcc   :  { %1533 = vmatpush.msrb.mxu3 %v1655_v35 }
 0xbcd   :  { %v1344_v48 = vadd.f32 %v1339_v47, %v2253_v50 }
 0xbcf   :  { %v1346_v34 = vsel %vm51_vm0, %v1344_v48, 0.0 }
 0xbd0   :  { %1347 = vadd.xlane.f32.xlu0 %v1346_v34  ;;  %v1654_v34 = vld [vmem:[%s2507_s3 + $0x50] sm:$0xff] }
 0xbd1   :  { %1534 = vmatpush.msrb.mxu3 %v1654_v34 }
 0xbf5   :  { %v1341_v37 = vpop.f32.mrf.mxu1 }
 0xbf6   :  { %v1342_v12 = vadd.f32 %v1341_v37, %v1312_v36  ;;  %v1653_v37 = vld [vmem:[%s2507_s3 + $0x48] sm:$0xff] }
 0xbf7   :  { %1535 = vmatpush.msrb.mxu3 %v1653_v37 }
 0xbf8   :  { %v1345_v49 = vadd.f32 %v1342_v12, %v2258_v0  ;;  %v1651_v0 = vld [vmem:[%s2506_s2 + $0x78] sm:$0xff] }
 0xbf9   :  { %1408 = vmatpush.msrb.mxu2 %v1651_v0 }
 0xbfa   :  { %v1349_v8 = vsel %vm51_vm0, %v1345_v49, 0.0 }
 0xbfb   :  { %1350 = vadd.xlane.f32.xlu1 %v1349_v8  ;;  %1409 = vmatpush.msrb.mxu2 %v1650_v2  ;;  %v1652_v8 = vld [vmem:[%s2507_s3 + $0x40] sm:$0xff]  ;;  %s1915_s3 = smov [#allocation2]  }
 0xbfc   :  { %1536 = vmatpush.msrb.mxu3 %v1652_v8  ;;  %s1596_s1 = sshll.u32 %s1915_s3, 4  ;;  %s1597_s1 = int_to_ptr.vmem [resolvable:$true] %s1596_s1 }
 0xbfd   :  { %1410 = vmatpush.msrb.mxu2 %v1649_v59 }
 0xbff   :  { %1411 = vmatpush.msrb.mxu2 %v1648_v61 }
 0xc14   :  { %1509 = vrot.lane.b32.xlu1 %v1661_v17, %s1909_s15 }
 0xc43   :  { %v1348_v51 = vpop.xlane.xlu0 %1347 }
 0xc44   :  { %v1352_v52 = vmul.f32 %v1348_v51, %v2150_v6 }
 0xc46   :  { %v1354_v53 = vsub.f32 %v1344_v48, %v1352_v52 }
 0xc48   :  { %v1356_v54 = vmul.f32 %v1354_v53, %v1354_v53 }
 0xc4a   :  { %v1358_v45 = vsel %vm51_vm0, %v1356_v54, 0.0 }
 0xc4b   :  { %1359 = vadd.xlane.f32.xlu2 %v1358_v45 }
 0xc63   :  { %1511 = vrot.lane.b32.xlu2 %v1663_v42, %s1909_s15 }
 0xc6e   :  { %v1351_v50 = vpop.xlane.xlu1 %1350 }
 0xc6f   :  { %v1353_v15 = vmul.f32 %v1351_v50, %v2150_v6 }
 0xc71   :  { %v1355_v55 = vsub.f32 %v1345_v49, %v1353_v15 }
 0xc73   :  { %v1357_v56 = vmul.f32 %v1355_v55, %v1355_v55 }
 0xc75   :  { %v1361_v57 = vsel %vm51_vm0, %v1357_v56, 0.0 }
 0xc76   :  { %1362 = vadd.xlane.f32.xlu0 %v1361_v57 }
 0xcbe   :  { %v1360_v3 = vpop.xlane.xlu2 %1359 }
 0xcbf   :  { %v1364_v4 = vmul.f32 %v1360_v3, %v2150_v6 }
 0xcc1   :  { %v1366_v5 = vadd.f32 1e-05, %v1364_v4 }
 0xcc3   :  { %1854 = vrsqrt.f32 %v1366_v5  ;;  %vm1374_vm2 = vweird.f32 %v1366_v5 }
 0xcc9   :  { %v1855_v63 = vpop.eup %1854 }
 0xcca   :  { %v1369_v9 = vmul.f32 %v1855_v63, %v1366_v5  ;;  %vm1375_vm1 = vweird.f32 %v1855_v63 }
 0xccb   :  { %vm1376_vm3 = vmor %vm1374_vm2, %vm1375_vm1 }
 0xccc   :  { %v1370_v7 = vmul.f32 %v1855_v63, %v1369_v9 }
 0xcce   :  { %v1371_v10 = vmul.f32 0.5, %v1370_v7 }
 0xcd0   :  { %v1372_v11 = vsub.f32 1.5, %v1371_v10 }
 0xcd2   :  { %v1373_v13 = vmul.f32 %v1855_v63, %v1372_v11 }
 0xcd4   :  { %v1377_v14 = vsel %vm1376_vm3, %v1855_v63, %v1373_v13 }
 0xcd5   :  { %v2441_v16 = vmul.f32 %v1377_v14, %v1354_v53 }
 0xcd7   :  { %1692 = vmatmul.msk.f32.vlgmr.msrb.gmra.mxu2 %vm51_vm0, %v2441_v16 }
 0xce9   :  { %v1363_v18 = vpop.xlane.xlu0 %1362 }
 0xcea   :  { %v1365_v19 = vmul.f32 %v1363_v18, %v2150_v6 }
 0xcec   :  { %v1367_v20 = vadd.f32 1e-05, %v1365_v19 }
 0xcee   :  { %1856 = vrsqrt.f32 %v1367_v20  ;;  %vm1384_vm4 = vweird.f32 %v1367_v20 }
 0xcf4   :  { %v1857_v21 = vpop.eup %1856 }
 0xcf5   :  { %v1379_v22 = vmul.f32 %v1857_v21, %v1367_v20  ;;  %vm1385_vm14 = vweird.f32 %v1857_v21 }
 0xcf6   :  { %vm1386_vm5 = vmor %vm1384_vm4, %vm1385_vm14 }
 0xcf7   :  { %v1380_v23 = vmul.f32 %v1857_v21, %v1379_v22 }
 0xcf9   :  { %v1381_v24 = vmul.f32 0.5, %v1380_v23 }
 0xcfb   :  { %v1382_v25 = vsub.f32 1.5, %v1381_v24 }
 0xcfd   :  { %v1383_v26 = vmul.f32 %v1857_v21, %v1382_v25 }
 0xcff   :  { %v1387_v27 = vsel %vm1386_vm5, %v1857_v21, %v1383_v26 }
 0xd00   :  { %v2450_v31 = vmul.f32 %v1387_v27, %v1355_v55 }
 0xd02   :  { %1693 = vmatmul.msk.f32.gmra.mxu2 %vm51_vm0, %v2450_v31 }
 0xd5a   :  { %v1413_v58 = vpop.f32.mrf.mxu2 }
 0xd5b   :  { %v2454_v62 = vadd.f32 %v1661_v17, %v1413_v58 }
 0xd5d   :  { %v1421_v28 = vmul.f32 0.70710677, %v2454_v62  ;;  %v1419_v18 = vmul.f32 0.5, %v2454_v62 }
 0xd5f   :  { %v1423_v29 = vmul.f32 %v1421_v28, %v1421_v28 }
 0xd61   :  { %v1424_v60 = vmin.f32 %v1423_v29, 16.0 }
 0xd63   :  { %v1425_v32 = vmul.f32 2.1237322e-06, %v1424_v60  ;;  %v1436_v39 = vmul.f32 3.8918573e-05, %v1424_v60 }
 0xd65   :  { %v1426_v38 = vadd.f32 0.00028619796, %v1425_v32  ;;  %v1437_v40 = vadd.f32 0.001143296, %v1436_v39 }
 0xd67   :  { %v1427_v44 = vmul.f32 %v1426_v38, %v1424_v60  ;;  %v1438_v46 = vmul.f32 %v1437_v40, %v1424_v60 }
 0xd69   :  { %v1439_v33 = vadd.f32 0.014752088, %v1438_v46  ;;  %v1428_v47 = vadd.f32 0.0036580483, %v1427_v44 }
 0xd6b   :  { %v1440_v48 = vmul.f32 %v1439_v33, %v1424_v60  ;;  %v1429_v12 = vmul.f32 %v1428_v47, %v1424_v60 }
 0xd6d   :  { %v1441_v36 = vadd.f32 0.112945676, %v1440_v48  ;;  %v1430_v52 = vadd.f32 0.05243302, %v1429_v12 }
 0xd6f   :  { %v1442_v49 = vmul.f32 %v1441_v36, %v1424_v60  ;;  %v1431_v45 = vmul.f32 %v1430_v52, %v1424_v60 }
 0xd71   :  { %v1443_v51 = vadd.f32 0.4994258, %v1442_v49  ;;  %v1432_v50 = vadd.f32 0.18741608, %v1431_v45  ;;  %v1510_v45 = vpop.permute.xlu1 %1509 }
 0xd73   :  { %v1444_v53 = vmul.f32 %v1443_v51, %v1424_v60  ;;  %v1433_v55 = vmul.f32 %v1432_v50, %v1424_v60 }
 0xd75   :  { %v1445_v54 = vadd.f32 1.0, %v1444_v53  ;;  %v1434_v2 = vadd.f32 1.1283791, %v1433_v55 }
 0xd77   :  { %1858 = vrcp.f32 %v1445_v54  ;;  %v1457_v0 = vand.u32 2147483648, %v1445_v54  ;;  %v1455_v61 = vand.u32 2147483647, %v1445_v54  ;;  %vm1451_vm7 = vweird.f32 %v1445_v54 }
 0xd78   :  { %v1435_v63 = vmul.f32 %v1434_v2, %v1421_v28 }
 0xd79   :  { %v1458_v4 = vor.u32 1.1754944e-38, %v1457_v0  ;;  %vm1456_vm9 = vcmp.eq.f32.partialorder %v1455_v61, 8.507059e+37 }
 0xd7d   :  { %v1859_v15 = vpop.eup %1858 }
 0xd7e   :  { %v1447_v56 = vmul.f32 %v1859_v15, %v1445_v54  ;;  %vm1452_vm6 = vweird.f32 %v1859_v15 }
 0xd7f   :  { %vm1453_vm8 = vmor %vm1451_vm7, %vm1452_vm6 }
 0xd80   :  { %v1448_v57 = vsub.f32 1.0, %v1447_v56 }
 0xd82   :  { %v1449_v59 = vmul.f32 %v1859_v15, %v1448_v57  ;;  %v1512_v57 = vpop.permute.xlu2 %1511 }
 0xd84   :  { %v1450_v3 = vadd.f32 %v1859_v15, %v1449_v59 }
 0xd85   :  { %v1416_v5 = vpop.f32.mrf.mxu2 }
 0xd86   :  { %v1454_v9 = vsel %vm1453_vm8, %v1859_v15, %v1450_v3  ;;  %v1417_v7 = vadd.f32 %v1663_v42, %v1416_v5 }
 0xd87   :  { %v1459_v10 = vsel %vm1456_vm9, %v1458_v4, %v1454_v9 }
 0xd88   :  { %v1460_v11 = vmul.f32 %v1459_v10, %v1435_v63  ;;  %v1422_v13 = vmul.f32 0.70710677, %v1417_v7  ;;  %v1420_v52 = vmul.f32 0.5, %v1417_v7 }
 0xd8a   :  { %v1694_v14 = vclamps-f32 %v1460_v11, 1.0  ;;  %v1463_v17 = vmul.f32 %v1422_v13, %v1422_v13 }
 0xd8c   :  { %v1503_v19 = vadd.f32 1.0, %v1694_v14  ;;  %v1464_v20 = vmin.f32 %v1463_v17, 16.0 }
 0xd8e   :  { %v1505_v21 = vmul.f32 %v1503_v19, %v1419_v18  ;;  %v1465_v22 = vmul.f32 2.1237322e-06, %v1464_v20  ;;  %v1476_v23 = vmul.f32 3.8918573e-05, %v1464_v20 }
 0xd90   :  { %v1466_v24 = vadd.f32 0.00028619796, %v1465_v22  ;;  %v1477_v25 = vadd.f32 0.001143296, %v1476_v23  ;;  %1696 = vmatmul.msk.f32.vlgmr.msrb.gmra.mxu3 %vm739_vm15, %v1505_v21 }
 0xd92   :  { %v1467_v26 = vmul.f32 %v1466_v24, %v1464_v20  ;;  %v1478_v27 = vmul.f32 %v1477_v25, %v1464_v20 }
 0xd94   :  { %v1479_v58 = vadd.f32 0.014752088, %v1478_v27  ;;  %v1468_v28 = vadd.f32 0.0036580483, %v1467_v26 }
 0xd96   :  { %v1480_v29 = vmul.f32 %v1479_v58, %v1464_v20  ;;  %v1469_v30 = vmul.f32 %v1468_v28, %v1464_v20 }
 0xd98   :  { %v1481_v60 = vadd.f32 0.112945676, %v1480_v29  ;;  %v1470_v1 = vadd.f32 0.05243302, %v1469_v30 }
 0xd9a   :  { %v1482_v32 = vmul.f32 %v1481_v60, %v1464_v20  ;;  %v1471_v40 = vmul.f32 %v1470_v1, %v1464_v20 }
 0xd9c   :  { %v1483_v39 = vadd.f32 0.4994258, %v1482_v32  ;;  %v1472_v41 = vadd.f32 0.18741608, %v1471_v40 }
 0xd9e   :  { %v1484_v62 = vmul.f32 %v1483_v39, %v1464_v20  ;;  %v1473_v44 = vmul.f32 %v1472_v41, %v1464_v20 }
 0xda0   :  { %v1485_v38 = vadd.f32 1.0, %v1484_v62  ;;  %v1474_v35 = vadd.f32 1.1283791, %v1473_v44 }
 0xda2   :  { %1860 = vrcp.f32 %v1485_v38  ;;  %v1497_v33 = vand.u32 2147483648, %v1485_v38  ;;  %v1495_v48 = vand.u32 2147483647, %v1485_v38  ;;  %vm1491_vm11 = vweird.f32 %v1485_v38 }
 0xda3   :  { %v1475_v37 = vmul.f32 %v1474_v35, %v1422_v13 }
 0xda4   :  { %v1498_v36 = vor.u32 1.1754944e-38, %v1497_v33  ;;  %vm1496_vm13 = vcmp.eq.f32.partialorder %v1495_v48, 8.507059e+37 }
 0xda8   :  { %v1861_v42 = vpop.eup %1860 }
 0xda9   :  { %v1487_v46 = vmul.f32 %v1861_v42, %v1485_v38  ;;  %vm1492_vm10 = vweird.f32 %v1861_v42 }
 0xdaa   :  { %vm1493_vm12 = vmor %vm1491_vm11, %vm1492_vm10 }
 0xdab   :  { %v1488_v43 = vsub.f32 1.0, %v1487_v46 }
 0xdad   :  { %v1489_v47 = vmul.f32 %v1861_v42, %v1488_v43 }
 0xdaf   :  { %v1490_v34 = vadd.f32 %v1861_v42, %v1489_v47 }
 0xdb1   :  { %v1494_v12 = vsel %vm1493_vm12, %v1861_v42, %v1490_v34 }
 0xdb2   :  { %v1499_v49 = vsel %vm1496_vm13, %v1498_v36, %v1494_v12 }
 0xdb3   :  { %v1500_v8 = vmul.f32 %v1499_v49, %v1475_v37 }
 0xdb5   :  { %v1695_v51 = vclamps-f32 %v1500_v8, 1.0 }
 0xdb7   :  { %v1504_v53 = vadd.f32 1.0, %v1695_v51 }
 0xdb9   :  { %v1506_v54 = vmul.f32 %v1504_v53, %v1420_v52 }
 0xdbb   :  { %1697 = vmatmul.msk.f32.gmra.mxu3 %vm739_vm15, %v1506_v54 }
 0xe13   :  { %v1538_v50 = vpop.f32.mrf.mxu3 }
 0xe14   :  { %v1539_v15 = vadd.f32 %v1538_v50, %v1510_v45 }
 0xe16   :  { %v1544_v55 = vadd.f32 %v1539_v15, %v2441_v16 }
 0xe18   :  { %v1546_v56 = vsel %vm51_vm0, %v1544_v55, 0.0 }
 0xe19   :  { %1547 = vadd.xlane.f32.xlu0 %v1546_v56 }
 0xe3e   :  { %v1541_v0 = vpop.f32.mrf.mxu3 }
 0xe3f   :  { %v1542_v2 = vadd.f32 %v1541_v0, %v1512_v57 }
 0xe41   :  { %v1545_v59 = vadd.f32 %v1542_v2, %v2450_v31 }
 0xe43   :  { %v1549_v61 = vsel %vm51_vm0, %v1545_v59, 0.0 }
 0xe44   :  { %1550 = vadd.xlane.f32.xlu0 %v1549_v61 }
 0xe8c   :  { %v1548_v3 = vpop.xlane.xlu0 %1547 }
 0xe8d   :  { %v1552_v4 = vmul.f32 %v1548_v3, %v2150_v6 }
 0xe8f   :  { %v1554_v5 = vsub.f32 %v1544_v55, %v1552_v4 }
 0xe91   :  { %v1556_v63 = vmul.f32 %v1554_v5, %v1554_v5 }
 0xe93   :  { %v1558_v9 = vsel %vm51_vm0, %v1556_v63, 0.0 }
 0xe94   :  { %1559 = vadd.xlane.f32.xlu0 %v1558_v9 }
 0xeb7   :  { %v1551_v16 = vpop.xlane.xlu0 %1550 }
 0xeb8   :  { %v1553_v7 = vmul.f32 %v1551_v16, %v2150_v6 }
 0xeba   :  { %v1555_v10 = vsub.f32 %v1545_v59, %v1553_v7 }
 0xebc   :  { %v1557_v11 = vmul.f32 %v1555_v10, %v1555_v10 }
 0xebe   :  { %v1561_v13 = vsel %vm51_vm0, %v1557_v11, 0.0 }
 0xebf   :  { %1562 = vadd.xlane.f32.xlu1 %v1561_v13 }
 0xf07   :  { %v1560_v31 = vpop.xlane.xlu0 %1559 }
 0xf08   :  { %v1564_v14 = vmul.f32 %v1560_v31, %v2150_v6 }
 0xf0a   :  { %v1566_v17 = vadd.f32 1e-05, %v1564_v14 }
 0xf0c   :  { %1862 = vrsqrt.f32 %v1566_v17  ;;  %vm1574_vm1 = vweird.f32 %v1566_v17 }
 0xf12   :  { %v1863_v18 = vpop.eup %1862 }
 0xf13   :  { %v1569_v19 = vmul.f32 %v1863_v18, %v1566_v17  ;;  %vm1575_vm15 = vweird.f32 %v1863_v18 }
 0xf14   :  { %vm1576_vm2 = vmor %vm1574_vm1, %vm1575_vm15 }
 0xf15   :  { %v1570_v20 = vmul.f32 %v1863_v18, %v1569_v19 }
 0xf17   :  { %v1571_v21 = vmul.f32 0.5, %v1570_v20 }
 0xf19   :  { %v1572_v22 = vsub.f32 1.5, %v1571_v21 }
 0xf1b   :  { %v1573_v23 = vmul.f32 %v1863_v18, %v1572_v22 }
 0xf1d   :  { %v1577_v24 = vsel %vm1576_vm2, %v1863_v18, %v1573_v23 }
 0xf1e   :  { %v1588_v25 = vmul.f32 %v1577_v24, %v1554_v5 }
 0xf20   :  { %1590 = vst.msk [vmem:[#allocation2] sm:$0xff] %vm51_vm0, %v1588_v25 }
 0xf32   :  { %v1563_v26 = vpop.xlane.xlu1 %1562 }
 0xf33   :  { %v1565_v27 = vmul.f32 %v1563_v26, %v2150_v6 }
 0xf35   :  { %v1567_v58 = vadd.f32 1e-05, %v1565_v27 }
 0xf37   :  { %1864 = vrsqrt.f32 %v1567_v58  ;;  %vm1584_vm14 = vweird.f32 %v1567_v58 }
 0xf3d   :  { %v1865_v28 = vpop.eup %1864 }
 0xf3e   :  { %v1579_v29 = vmul.f32 %v1865_v28, %v1567_v58  ;;  %vm1585_vm3 = vweird.f32 %v1865_v28 }
 0xf3f   :  { %vm1586_vm4 = vmor %vm1584_vm14, %vm1585_vm3 }
 0xf40   :  { %v1580_v60 = vmul.f32 %v1865_v28, %v1579_v29 }
 0xf42   :  { %v1581_v30 = vmul.f32 0.5, %v1580_v60 }
 0xf44   :  { %v1582_v32 = vsub.f32 1.5, %v1581_v30 }
 0xf46   :  { %v1583_v39 = vmul.f32 %v1865_v28, %v1582_v32 }
 0xf48   :  { %v1587_v1 = vsel %vm1586_vm4, %v1865_v28, %v1583_v39 }
 0xf49   :  { %v1589_v6 = vmul.f32 %v1587_v1, %v1555_v10 }
 0xf4b   :  { %1591 = vst.msk [vmem:[#allocation2 + $0x8] sm:$0xff] %vm51_vm0, %v1589_v6 }
 0xf4c   :  { %1604 = dma.vmem_to_hbm [thread:$0]  %s1597_s1, 256, %s1599_s9, [#allocation3], %s1916_s16, %s1916_s16, %s1911_s17  }
 0xf4d   :  { %1897 = dma.done.wait [#allocation3], 256  }
 0xf4e   :  { %1898 = vsyncadd [#allocation3], 4294967040 }
 0xf4f   :  { %1609 = vsyncpa [#allocation3], 1 }

</bundles_post_ra>
